<compile_context>
chip_gen: v7x
topology: tpu7x:2x2x1
jax: 0.10.0
libtpu: 0.0.40
codegen_flags: <defaults>
</compile_context>

<pallas_src>
import functools
import math

import jax
import jax.numpy as jnp
from jax import lax
from jax.experimental import pallas as pl
from jax.experimental.pallas import tpu as pltpu


# ----------------------------- tiling helpers ------------------------------

_VMEM_LIMIT = 48 * 1024 * 1024  # safe on v5e/v6e (128 MiB) and v7x (64 MiB physical)


def _cparams(*sem):
    return pltpu.CompilerParams(
        dimension_semantics=tuple(sem),
        vmem_limit_bytes=_VMEM_LIMIT,
    )


def _row_tile(m, cap=512):
    """Largest row tile (multiple of 128 preferred) that divides m, capped for VMEM."""
    if m <= cap:
        return m
    for t in (512, 384, 256, 128, 64, 32, 16, 8):
        if t <= cap and m % t == 0:
            return t
    return m  # block == full dim is always legal


def _inter_tile(inter, cap=512):
    """Tile of the FFN intermediate axis: multiple of 128 (lane constraint) or full."""
    if inter <= cap:
        return inter
    for t in (512, 384, 256, 128):
        if inter % t == 0:
            return t
    return inter


# ----------------------------- Pallas kernels ------------------------------


def _add_ln_kernel(x_ref, r_ref, g_ref, b_ref, o_ref, *, eps):
    """LayerNorm(x + residual) over the last axis; math in f32, output bf16."""
    x = x_ref[...].astype(jnp.float32) + r_ref[...].astype(jnp.float32)
    mean = jnp.mean(x, axis=-1, keepdims=True)
    d = x - mean
    var = jnp.mean(d * d, axis=-1, keepdims=True)
    y = d * lax.rsqrt(var + eps)
    o_ref[...] = (y * g_ref[...] + b_ref[...]).astype(o_ref.dtype)


def _dense_kernel(x_ref, w_ref, b_ref, o_ref):
    """y = x @ w + b. bf16 MXU inputs, f32 accumulate. Used for the fused QKV projection."""
    y = jnp.dot(x_ref[...], w_ref[...], preferred_element_type=jnp.float32) + b_ref[...]
    o_ref[...] = y.astype(o_ref.dtype)


def _dense_add_ln_kernel(x_ref, w_ref, b_ref, r_ref, g_ref, bln_ref, o_ref, *, eps):
    """LayerNorm((x @ w + b) + residual): fused attention-output projection + LN1."""
    y = jnp.dot(x_ref[...], w_ref[...], preferred_element_type=jnp.float32) + b_ref[...]
    y = y + r_ref[...].astype(jnp.float32)
    mean = jnp.mean(y, axis=-1, keepdims=True)
    d = y - mean
    var = jnp.mean(d * d, axis=-1, keepdims=True)
    yn = d * lax.rsqrt(var + eps)
    o_ref[...] = (yn * g_ref[...] + bln_ref[...]).astype(o_ref.dtype)


def _ffn_kernel(x_ref, w1_ref, b1_ref, w2_ref, b2_ref, g_ref, bln_ref, o_ref,
                acc_ref, *, eps):
    """Fused FFN: LayerNorm(gelu(x@w1+b1)@w2 + b2 + x), tiling the intermediate axis.

    Grid = (rows, inter_tiles); inter axis is an "arbitrary" reduction with an f32 accumulator.
    """
    ki = pl.program_id(1)

    @pl.when(ki == 0)
    def _():
        acc_ref[...] = jnp.zeros_like(acc_ref)

    h = jnp.dot(x_ref[...], w1_ref[...], preferred_element_type=jnp.float32) + b1_ref[...]
    # tanh-approx gelu (differs from BERT's erf-gelu by <~1e-3; EUP-friendly on TPU)
    h = jax.nn.gelu(h, approximate=True)
    acc_ref[...] += jnp.dot(h.astype(w2_ref.dtype), w2_ref[...],
                            preferred_element_type=jnp.float32)

    @pl.when(ki == pl.num_programs(1) - 1)
    def _():
        y = acc_ref[...] + b2_ref[...] + x_ref[...].astype(jnp.float32)
        mean = jnp.mean(y, axis=-1, keepdims=True)
        d = y - mean
        var = jnp.mean(d * d, axis=-1, keepdims=True)
        yn = d * lax.rsqrt(var + eps)
        o_ref[...] = (yn * g_ref[...] + bln_ref[...]).astype(o_ref.dtype)


def _attention_kernel(qkv_ref, bias_ref, o_ref, *, n_heads, head_dim, scale):
    """Per-batch multi-head self-attention.

    qkv_ref: (S, 3H) bf16 slab for one batch; heads are split with static column slices
    (no HBM-level transposes). bias_ref: (1, 1, S) additive key mask. Output ctx: (S, H).
    """
    # TODO(synk): for long sequences switch to per-head + KV-tiled (flash-style) blocking;
    # full (S, S) scores per head are fine at these sizes.
    H = n_heads * head_dim
    qkv = qkv_ref[...]
    bias = bias_ref[0]                                   # (1, S) f32
    ctx_heads = []
    for h in range(n_heads):
        q = qkv[:, h * head_dim:(h + 1) * head_dim]
        k = qkv[:, H + h * head_dim:H + (h + 1) * head_dim]
        v = qkv[:, 2 * H + h * head_dim:2 * H + (h + 1) * head_dim]
        s = lax.dot_general(q, k, (((1,), (1,)), ((), ())),
                            preferred_element_type=jnp.float32) * scale   # (S, S)
        s = s + bias                                     # broadcast over query rows
        m = jnp.max(s, axis=-1, keepdims=True)
        p = jnp.exp(s - m)
        p = p * pl.reciprocal(jnp.sum(p, axis=-1, keepdims=True), approx=True)
        ctx_heads.append(jnp.dot(p.astype(v.dtype), v,
                                 preferred_element_type=jnp.float32))     # (S, Dh)
    o_ref[...] = jnp.concatenate(ctx_heads, axis=-1).astype(o_ref.dtype)


def _pool_cls_kernel(x_ref, wp_ref, bp_ref, wc_ref, bc_ref, o_ref):
    """Fused BERT pooler (tanh dense on CLS) + classifier + sigmoid. Single tiny launch."""
    pooled = jnp.tanh(jnp.dot(x_ref[...], wp_ref[...],
                              preferred_element_type=jnp.float32) + bp_ref[...])
    logits = jnp.dot(pooled.astype(wc_ref.dtype), wc_ref[...],
                     preferred_element_type=jnp.float32) + bc_ref[...]
    o_ref[...] = jax.nn.sigmoid(logits)


# ----------------------------- kernel wrappers ------------------------------


def add_layernorm(x, residual, gamma, beta, eps=1e-12):
    M, H = x.shape
    tm = _row_tile(M)
    return pl.pallas_call(
        functools.partial(_add_ln_kernel, eps=eps),
        out_shape=jax.ShapeDtypeStruct((M, H), jnp.bfloat16),
        grid=(M // tm,),
        in_specs=[
            pl.BlockSpec((tm, H), lambda i: (i, 0)),
            pl.BlockSpec((tm, H), lambda i: (i, 0)),
            pl.BlockSpec((1, H), lambda i: (0, 0)),
            pl.BlockSpec((1, H), lambda i: (0, 0)),
        ],
        out_specs=pl.BlockSpec((tm, H), lambda i: (i, 0)),
        compiler_params=_cparams("parallel"),
    )(x, residual, gamma.reshape(1, H), beta.reshape(1, H))


def dense(x, w, b):
    """Plain dense (used for the fused QKV projection): one pallas_call for all of Q,K,V."""
    M, K = x.shape
    N = w.shape[1]
    tm = _row_tile(M)
    return pl.pallas_call(
        _dense_kernel,
        out_shape=jax.ShapeDtypeStruct((M, N), jnp.bfloat16),
        grid=(M // tm,),
        in_specs=[
            pl.BlockSpec((tm, K), lambda i: (i, 0)),
            pl.BlockSpec((K, N), lambda i: (0, 0)),
            pl.BlockSpec((1, N), lambda i: (0, 0)),
        ],
        out_specs=pl.BlockSpec((tm, N), lambda i: (i, 0)),
        compiler_params=_cparams("parallel"),
    )(x, w, b.reshape(1, N))


def dense_add_ln(x, w, b, residual, gamma, beta, eps=1e-12):
    M, K = x.shape
    N = w.shape[1]
    tm = _row_tile(M)
    return pl.pallas_call(
        functools.partial(_dense_add_ln_kernel, eps=eps),
        out_shape=jax.ShapeDtypeStruct((M, N), jnp.bfloat16),
        grid=(M // tm,),
        in_specs=[
            pl.BlockSpec((tm, K), lambda i: (i, 0)),
            pl.BlockSpec((K, N), lambda i: (0, 0)),
            pl.BlockSpec((1, N), lambda i: (0, 0)),
            pl.BlockSpec((tm, N), lambda i: (i, 0)),
            pl.BlockSpec((1, N), lambda i: (0, 0)),
            pl.BlockSpec((1, N), lambda i: (0, 0)),
        ],
        out_specs=pl.BlockSpec((tm, N), lambda i: (i, 0)),
        compiler_params=_cparams("parallel"),
    )(x, w, b.reshape(1, N), residual, gamma.reshape(1, N), beta.reshape(1, N))


def ffn_add_ln(x, w1, b1, w2, b2, gamma, beta, eps=1e-12):
    M, H = x.shape
    inter = w1.shape[1]
    tm = _row_tile(M)
    tki = _inter_tile(inter)
    return pl.pallas_call(
        functools.partial(_ffn_kernel, eps=eps),
        out_shape=jax.ShapeDtypeStruct((M, H), jnp.bfloat16),
        grid=(M // tm, inter // tki),
        in_specs=[
            pl.BlockSpec((tm, H), lambda i, k: (i, 0)),     # x (resident across k; also residual)
            pl.BlockSpec((H, tki), lambda i, k: (0, k)),    # w1 tile
            pl.BlockSpec((1, tki), lambda i, k: (0, k)),    # b1 tile
            pl.BlockSpec((tki, H), lambda i, k: (k, 0)),    # w2 tile
            pl.BlockSpec((1, H), lambda i, k: (0, 0)),      # b2
            pl.BlockSpec((1, H), lambda i, k: (0, 0)),      # ln gamma
            pl.BlockSpec((1, H), lambda i, k: (0, 0)),      # ln beta
        ],
        out_specs=pl.BlockSpec((tm, H), lambda i, k: (i, 0)),
        scratch_shapes=[pltpu.VMEM((tm, H), jnp.float32)],
        compiler_params=_cparams("parallel", "arbitrary"),
    )(x, w1, b1.reshape(1, inter), w2, b2.reshape(1, H),
      gamma.reshape(1, H), beta.reshape(1, H))


def attention(qkv, mask_bias, B, S, n_heads, head_dim):
    """qkv: (B*S, 3H) bf16; mask_bias: (B, 1, S) f32. Returns ctx (B*S, H) bf16."""
    H = n_heads * head_dim
    scale = 1.0 / math.sqrt(head_dim)
    return pl.pallas_call(
        functools.partial(_attention_kernel, n_heads=n_heads, head_dim=head_dim,
                          scale=scale),
        out_shape=jax.ShapeDtypeStruct((B * S, H), jnp.bfloat16),
        grid=(B,),
        in_specs=[
            pl.BlockSpec((S, 3 * H), lambda b: (b, 0)),
            pl.BlockSpec((1, 1, S), lambda b: (b, 0, 0)),
        ],
        out_specs=pl.BlockSpec((S, H), lambda b: (b, 0)),
        compiler_params=_cparams("parallel"),
    )(qkv, mask_bias)


def pool_classify(cls, wp, bp, wc, bc):
    B, H = cls.shape
    L = wc.shape[1]
    return pl.pallas_call(
        _pool_cls_kernel,
        out_shape=jax.ShapeDtypeStruct((B, L), jnp.float32),
        grid=(1,),
        in_specs=[
            pl.BlockSpec((B, H), lambda i: (0, 0)),
            pl.BlockSpec((H, H), lambda i: (0, 0)),
            pl.BlockSpec((1, H), lambda i: (0, 0)),
            pl.BlockSpec((H, L), lambda i: (0, 0)),
            pl.BlockSpec((1, L), lambda i: (0, 0)),
        ],
        out_specs=pl.BlockSpec((B, L), lambda i: (0, 0)),
        compiler_params=_cparams("arbitrary"),
    )(cls, wp, bp.reshape(1, H), wc, bc.reshape(1, L))


# ----------------------------- model (JAX glue) ------------------------------


def init_params(key, *, vocab, max_pos, type_vocab, hidden, n_heads, inter,
                n_layers, n_labels):
    def nrm(k, shape, scale=0.02):
        return (scale * jax.random.normal(k, shape, jnp.float32)).astype(jnp.bfloat16)

    keys = jax.random.split(key, 4 + n_layers)
    p = {
        "word_emb": nrm(keys[0], (vocab, hidden)),
        "pos_emb": nrm(keys[1], (max_pos, hidden)),
        "type_emb": nrm(keys[2], (type_vocab, hidden)),
        "emb_ln_g": jnp.ones((hidden,), jnp.float32),
        "emb_ln_b": jnp.zeros((hidden,), jnp.float32),
        "layers": [],
    }
    for li in range(n_layers):
        lk = jax.random.split(keys[3 + li], 4)
        p["layers"].append({
            # fused Q|K|V weight: (H, 3H)
            "wqkv": nrm(lk[0], (hidden, 3 * hidden)), "bqkv": jnp.zeros((3 * hidden,), jnp.float32),
            "wo": nrm(lk[1], (hidden, hidden)), "bo": jnp.zeros((hidden,), jnp.float32),
            "ln1_g": jnp.ones((hidden,), jnp.float32), "ln1_b": jnp.zeros((hidden,), jnp.float32),
            "w1": nrm(lk[2], (hidden, inter)), "b1": jnp.zeros((inter,), jnp.float32),
            "w2": nrm(lk[3], (inter, hidden)), "b2": jnp.zeros((hidden,), jnp.float32),
            "ln2_g": jnp.ones((hidden,), jnp.float32), "ln2_b": jnp.zeros((hidden,), jnp.float32),
        })
    pk = jax.random.split(keys[-1], 2)
    p["pool_w"] = nrm(pk[0], (hidden, hidden))
    p["pool_b"] = jnp.zeros((hidden,), jnp.float32)
    # classifier: xavier-uniform-like init, zero bias (matches init_weights())
    limit = math.sqrt(6.0 / (hidden + n_labels))
    p["cls_w"] = jax.random.uniform(pk[1], (hidden, n_labels), jnp.float32,
                                    -limit, limit).astype(jnp.bfloat16)
    p["cls_b"] = jnp.zeros((n_labels,), jnp.float32)
    return p


def bert_layer(x, lp, mask_bias, B, S, n_heads, head_dim):
    # fused QKV projection (one pallas_call, one HBM read of x)
    qkv = dense(x, lp["wqkv"], lp["bqkv"])                         # (B*S, 3H)
    # per-batch multi-head attention; head split done in-kernel (no XLA transposes)
    ctx = attention(qkv, mask_bias, B, S, n_heads, head_dim)       # (B*S, H)
    # output projection + residual + LayerNorm (fused)
    x = dense_add_ln(ctx, lp["wo"], lp["bo"], x, lp["ln1_g"], lp["ln1_b"])
    # fused FFN (w1 -> gelu -> w2 -> +residual -> LayerNorm), inter axis tiled
    x = ffn_add_ln(x, lp["w1"], lp["b1"], lp["w2"], lp["b2"], lp["ln2_g"], lp["ln2_b"])
    return x


def event_detection_forward(params, input_ids, token_type_ids, attention_mask,
                            *, n_heads, threshold=0.5):
    """Returns sigmoid probs (training branch) and thresholded preds (eval branch)."""
    B, S = input_ids.shape
    H = params["word_emb"].shape[1]
    head_dim = H // n_heads

    # Embeddings (lookups = glue; add + LayerNorm runs in the Pallas kernel).
    word = jnp.take(params["word_emb"], input_ids, axis=0).reshape(B * S, H)
    pos = jnp.take(params["pos_emb"], jnp.arange(S), axis=0)
    pos = jnp.broadcast_to(pos[None, :, :], (B, S, H)).reshape(B * S, H)
    typ = jnp.take(params["type_emb"], token_type_ids, axis=0).reshape(B * S, H)
    x = add_layernorm(word, pos + typ, params["emb_ln_g"], params["emb_ln_b"])

    # Additive mask bias: 0 where attended, -1e4 where masked.  (B, 1, S)
    mask_bias = (1.0 - attention_mask.astype(jnp.float32))[:, None, :] * -1e4

    for lp in params["layers"]:
        x = bert_layer(x, lp, mask_bias, B, S, n_heads, head_dim)

    # BERT pooler (tanh dense on CLS) + classifier + sigmoid, fused into one tiny kernel.
    cls = x.reshape(B, S, H)[:, 0, :]                              # (B, H)
    probs = pool_classify(cls, params["pool_w"], params["pool_b"],
                          params["cls_w"], params["cls_b"])
    # NOTE: dropout before the classifier is identity at inference.

    # Eval-branch thresholding.
    # TODO(synk): mapping thresholded indices -> event-type name strings is host-side Python.
    preds = (probs > threshold).astype(jnp.int32)
    return probs, preds


# ----------------------------- driver ------------------------------


if __name__ == "__main__":
    B, S = 2, 8
    HIDDEN, N_HEADS, INTER, N_LAYERS = 64, 4, 1024, 2   # INTER > 512 exercises the FFN K-tiling
    VOCAB, MAX_POS, TYPE_VOCAB, N_LABELS = 128, 16, 2, 8

    root = jax.random.PRNGKey(0)
    k_param, k_ids = jax.random.split(root)

    params = init_params(k_param, vocab=VOCAB, max_pos=MAX_POS,
                         type_vocab=TYPE_VOCAB, hidden=HIDDEN, n_heads=N_HEADS,
                         inter=INTER, n_layers=N_LAYERS, n_labels=N_LABELS)

    input_ids = jax.random.randint(k_ids, (B, S), 0, VOCAB, dtype=jnp.int32)
    token_type_ids = jnp.zeros((B, S), jnp.int32)
    attention_mask = jnp.ones((B, S), jnp.int32)

    forward = jax.jit(functools.partial(event_detection_forward,
                                        n_heads=N_HEADS, threshold=0.5))
    probs, preds = forward(params, input_ids, token_type_ids, attention_mask)
    jax.block_until_ready((probs, preds))

    assert probs.shape == (B, N_LABELS) and preds.shape == (B, N_LABELS)
    assert bool(jnp.all(jnp.isfinite(probs)))
    print("KERNEL_OK")
</pallas_src>

<mosaic_0001>
module attributes {stable_mosaic.version = 11 : i64} {
  func.func @_dense_kernel(%arg0: i32, %arg1: memref<16x64xbf16, #tpu.memory_space<vmem>>, %arg2: memref<64x192xbf16, #tpu.memory_space<vmem>>, %arg3: memref<1x192xf32, #tpu.memory_space<vmem>>, %arg4: memref<16x192xbf16, #tpu.memory_space<vmem>>) attributes {dimension_semantics = [#tpu.dimension_semantics<parallel>], iteration_bounds = array<i64: 1>, scalar_prefetch = 0 : i64, scratch_operands = 0 : i64, tpu.core_type = #tpu.core_type<tc>, window_params = [{transform_indices = @transform_0, window_bounds = array<i64: 16, 64>}, {pipeline_mode = #tpu.pipeline_mode<synchronous>, transform_indices = @transform_1, window_bounds = array<i64: 64, 192>}, {pipeline_mode = #tpu.pipeline_mode<synchronous>, transform_indices = @transform_2, window_bounds = array<i64: 1, 192>}, {transform_indices = @transform_3, window_bounds = array<i64: 16, 192>}]} {
    %c0 = arith.constant 0 : index
    %c0_0 = arith.constant 0 : index
    %0 = vector.load %arg1[%c0, %c0_0] : memref<16x64xbf16, #tpu.memory_space<vmem>>, vector<16x64xbf16>
    %c0_1 = arith.constant 0 : index
    %c0_2 = arith.constant 0 : index
    %1 = vector.load %arg2[%c0_1, %c0_2] : memref<64x192xbf16, #tpu.memory_space<vmem>>, vector<64x192xbf16>
    %cst = arith.constant dense<0.000000e+00> : vector<16x192xf32>
    %2 = tpu.matmul %0, %1, %cst {dimension_numbers = #tpu.dot_dimension_numbers<[1], [0], [0], [1], [0, 0, 1, 1], [], []>} : vector<16x64xbf16>, vector<64x192xbf16>, vector<16x192xf32> -> vector<16x192xf32>
    %c0_3 = arith.constant 0 : index
    %c0_4 = arith.constant 0 : index
    %3 = vector.load %arg3[%c0_3, %c0_4] : memref<1x192xf32, #tpu.memory_space<vmem>>, vector<1x192xf32>
    %4 = vector.broadcast %3 : vector<1x192xf32> to vector<16x192xf32>
    %5 = arith.addf %2, %4 : vector<16x192xf32>
    %6 = arith.truncf %5 : vector<16x192xf32> to vector<16x192xbf16>
    %c0_5 = arith.constant 0 : index
    %c0_6 = arith.constant 0 : index
    %7 = vector.load %arg4[%c0_5, %c0_6] : memref<16x192xbf16, #tpu.memory_space<vmem>>, vector<16x192xbf16>
    tpu.vector_store %arg4[%c0_5, %c0_6], %6 {strides = array<i32>} : memref<16x192xbf16, #tpu.memory_space<vmem>>, vector<16x192xbf16>,
    return
  }
  func.func @transform_0(%arg0: i32) -> (i32, i32) {
    %c0_i32 = arith.constant 0 : i32
    %c0_i32_0 = arith.constant 0 : i32
    return %arg0, %c0_i32 : i32, i32
  }
  func.func @transform_1(%arg0: i32) -> (i32, i32) {
    %c0_i32 = arith.constant 0 : i32
    %c0_i32_0 = arith.constant 0 : i32
    %c0_i32_1 = arith.constant 0 : i32
    return %c0_i32, %c0_i32_0 : i32, i32
  }
  func.func @transform_2(%arg0: i32) -> (i32, i32) {
    %c0_i32 = arith.constant 0 : i32
    %c0_i32_0 = arith.constant 0 : i32
    %c0_i32_1 = arith.constant 0 : i32
    return %c0_i32, %c0_i32_0 : i32, i32
  }
  func.func @transform_3(%arg0: i32) -> (i32, i32) {
    %c0_i32 = arith.constant 0 : i32
    %c0_i32_0 = arith.constant 0 : i32
    return %arg0, %c0_i32 : i32, i32
  }
}

module attributes {stable_mosaic.version = 11 : i64} {
  func.func @_add_ln_kernel(%arg0: i32, %arg1: memref<16x64xbf16, #tpu.memory_space<vmem>>, %arg2: memref<16x64xbf16, #tpu.memory_space<vmem>>, %arg3: memref<1x64xf32, #tpu.memory_space<vmem>>, %arg4: memref<1x64xf32, #tpu.memory_space<vmem>>, %arg5: memref<16x64xbf16, #tpu.memory_space<vmem>>) attributes {dimension_semantics = [#tpu.dimension_semantics<parallel>], iteration_bounds = array<i64: 1>, scalar_prefetch = 0 : i64, scratch_operands = 0 : i64, tpu.core_type = #tpu.core_type<tc>, window_params = [{transform_indices = @transform_0, window_bounds = array<i64: 16, 64>}, {transform_indices = @transform_1, window_bounds = array<i64: 16, 64>}, {pipeline_mode = #tpu.pipeline_mode<synchronous>, transform_indices = @transform_2, window_bounds = array<i64: 1, 64>}, {pipeline_mode = #tpu.pipeline_mode<synchronous>, transform_indices = @transform_3, window_bounds = array<i64: 1, 64>}, {transform_indices = @transform_4, window_bounds = array<i64: 16, 64>}]} {
    %c0 = arith.constant 0 : index
    %c0_0 = arith.constant 0 : index
    %0 = vector.load %arg1[%c0, %c0_0] : memref<16x64xbf16, #tpu.memory_space<vmem>>, vector<16x64xbf16>
    %1 = arith.extf %0 : vector<16x64xbf16> to vector<16x64xf32>
    %c0_1 = arith.constant 0 : index
    %c0_2 = arith.constant 0 : index
    %2 = vector.load %arg2[%c0_1, %c0_2] : memref<16x64xbf16, #tpu.memory_space<vmem>>, vector<16x64xbf16>
    %3 = arith.extf %2 : vector<16x64xbf16> to vector<16x64xf32>
    %4 = arith.addf %1, %3 : vector<16x64xf32>
    %cst = arith.constant dense<0.000000e+00> : vector<16xf32>
    %5 = vector.multi_reduction <add>, %4, %cst [1] : vector<16x64xf32> to vector<16xf32>
    %6 = vector.shape_cast %5 : vector<16xf32> to vector<16x1xf32>
    %cst_3 = arith.constant 6.400000e+01 : f32
    %7 = vector.broadcast %cst_3 : f32 to vector<16x1xf32>
    %8 = arith.divf %6, %7 : vector<16x1xf32>
    %9 = vector.broadcast %8 : vector<16x1xf32> to vector<16x64xf32>
    %10 = arith.subf %4, %9 : vector<16x64xf32>
    %11 = arith.mulf %10, %10 : vector<16x64xf32>
    %cst_4 = arith.constant dense<0.000000e+00> : vector<16xf32>
    %12 = vector.multi_reduction <add>, %11, %cst_4 [1] : vector<16x64xf32> to vector<16xf32>
    %13 = vector.shape_cast %12 : vector<16xf32> to vector<16x1xf32>
    %cst_5 = arith.constant 6.400000e+01 : f32
    %14 = vector.broadcast %cst_5 : f32 to vector<16x1xf32>
    %15 = arith.divf %13, %14 : vector<16x1xf32>
    %cst_6 = arith.constant 9.99999996E-13 : f32
    %16 = vector.broadcast %cst_6 : f32 to vector<16x1xf32>
    %17 = arith.addf %15, %16 : vector<16x1xf32>
    %18 = math.rsqrt %17 : vector<16x1xf32>
    %19 = vector.broadcast %18 : vector<16x1xf32> to vector<16x64xf32>
    %20 = arith.mulf %10, %19 : vector<16x64xf32>
    %c0_7 = arith.constant 0 : index
    %c0_8 = arith.constant 0 : index
    %21 = vector.load %arg3[%c0_7, %c0_8] : memref<1x64xf32, #tpu.memory_space<vmem>>, vector<1x64xf32>
    %22 = vector.broadcast %21 : vector<1x64xf32> to vector<16x64xf32>
    %23 = arith.mulf %20, %22 : vector<16x64xf32>
    %c0_9 = arith.constant 0 : index
    %c0_10 = arith.constant 0 : index
    %24 = vector.load %arg4[%c0_9, %c0_10] : memref<1x64xf32, #tpu.memory_space<vmem>>, vector<1x64xf32>
    %25 = vector.broadcast %24 : vector<1x64xf32> to vector<16x64xf32>
    %26 = arith.addf %23, %25 : vector<16x64xf32>
    %27 = arith.truncf %26 : vector<16x64xf32> to vector<16x64xbf16>
    %c0_11 = arith.constant 0 : index
    %c0_12 = arith.constant 0 : index
    %28 = vector.load %arg5[%c0_11, %c0_12] : memref<16x64xbf16, #tpu.memory_space<vmem>>, vector<16x64xbf16>
    tpu.vector_store %arg5[%c0_11, %c0_12], %27 {strides = array<i32>} : memref<16x64xbf16, #tpu.memory_space<vmem>>, vector<16x64xbf16>,
    return
  }
  func.func @transform_0(%arg0: i32) -> (i32, i32) {
    %c0_i32 = arith.constant 0 : i32
    %c0_i32_0 = arith.constant 0 : i32
    return %arg0, %c0_i32 : i32, i32
  }
  func.func @transform_1(%arg0: i32) -> (i32, i32) {
    %c0_i32 = arith.constant 0 : i32
    %c0_i32_0 = arith.constant 0 : i32
    return %arg0, %c0_i32 : i32, i32
  }
  func.func @transform_2(%arg0: i32) -> (i32, i32) {
    %c0_i32 = arith.constant 0 : i32
    %c0_i32_0 = arith.constant 0 : i32
    %c0_i32_1 = arith.constant 0 : i32
    return %c0_i32, %c0_i32_0 : i32, i32
  }
  func.func @transform_3(%arg0: i32) -> (i32, i32) {
    %c0_i32 = arith.constant 0 : i32
    %c0_i32_0 = arith.constant 0 : i32
    %c0_i32_1 = arith.constant 0 : i32
    return %c0_i32, %c0_i32_0 : i32, i32
  }
  func.func @transform_4(%arg0: i32) -> (i32, i32) {
    %c0_i32 = arith.constant 0 : i32
    %c0_i32_0 = arith.constant 0 : i32
    return %arg0, %c0_i32 : i32, i32
  }
}

module attributes {stable_mosaic.version = 11 : i64} {
  func.func @_attention_kernel(%arg0: i32, %arg1: memref<8x192xbf16, #tpu.memory_space<vmem>>, %arg2: memref<1x1x8xf32, #tpu.memory_space<vmem>>, %arg3: memref<8x64xbf16, #tpu.memory_space<vmem>>) attributes {dimension_semantics = [#tpu.dimension_semantics<parallel>], iteration_bounds = array<i64: 2>, scalar_prefetch = 0 : i64, scratch_operands = 0 : i64, tpu.core_type = #tpu.core_type<tc>, window_params = [{transform_indices = @transform_0, window_bounds = array<i64: 8, 192>}, {transform_indices = @transform_1, window_bounds = array<i64: 1, 1, 8>}, {transform_indices = @transform_2, window_bounds = array<i64: 8, 64>}]} {
    %c0 = arith.constant 0 : index
    %c0_0 = arith.constant 0 : index
    %0 = vector.load %arg1[%c0, %c0_0] : memref<8x192xbf16, #tpu.memory_space<vmem>>, vector<8x192xbf16>
    %c0_1 = arith.constant 0 : index
    %c0_2 = arith.constant 0 : index
    %c0_3 = arith.constant 0 : index
    %1 = vector.load %arg2[%c0_1, %c0_2, %c0_3] : memref<1x1x8xf32, #tpu.memory_space<vmem>>, vector<1x1x8xf32>
    %2 = vector.shape_cast %1 : vector<1x1x8xf32> to vector<1x8xf32>
    %3 = vector.extract_strided_slice %0 {offsets = [0, 0], sizes = [8, 16], strides = [1, 1]} : vector<8x192xbf16> to vector<8x16xbf16>
    %4 = vector.extract_strided_slice %0 {offsets = [0, 64], sizes = [8, 16], strides = [1, 1]} : vector<8x192xbf16> to vector<8x16xbf16>
    %5 = vector.extract_strided_slice %0 {offsets = [0, 128], sizes = [8, 16], strides = [1, 1]} : vector<8x192xbf16> to vector<8x16xbf16>
    %cst = arith.constant dense<0.000000e+00> : vector<8x8xf32>
    %6 = tpu.matmul %3, %4, %cst {dimension_numbers = #tpu.dot_dimension_numbers<[1], [1], [0], [0], [0, 0, 1, 0], [], []>} : vector<8x16xbf16>, vector<8x16xbf16>, vector<8x8xf32> -> vector<8x8xf32>
    %cst_4 = arith.constant 2.500000e-01 : f32
    %7 = vector.broadcast %cst_4 : f32 to vector<8x8xf32>
    %8 = arith.mulf %6, %7 : vector<8x8xf32>
    %9 = vector.broadcast %2 : vector<1x8xf32> to vector<8x8xf32>
    %10 = arith.addf %8, %9 : vector<8x8xf32>
    %cst_5 = arith.constant dense<0xFF800000> : vector<8xf32>
    %11 = vector.multi_reduction <maximumf>, %10, %cst_5 [1] : vector<8x8xf32> to vector<8xf32>
    %12 = vector.shape_cast %11 : vector<8xf32> to vector<8x1xf32>
    %13 = vector.broadcast %12 : vector<8x1xf32> to vector<8x8xf32>
    %14 = arith.subf %10, %13 : vector<8x8xf32>
    %15 = math.exp %14 : vector<8x8xf32>
    %cst_6 = arith.constant dense<0.000000e+00> : vector<8xf32>
    %16 = vector.multi_reduction <add>, %15, %cst_6 [1] : vector<8x8xf32> to vector<8xf32>
    %17 = vector.shape_cast %16 : vector<8xf32> to vector<8x1xf32>
    %18 = tpu.reciprocal %17 {approx = true} : vector<8x1xf32> -> vector<8x1xf32>
    %19 = vector.broadcast %18 : vector<8x1xf32> to vector<8x8xf32>
    %20 = arith.mulf %15, %19 : vector<8x8xf32>
    %21 = arith.truncf %20 : vector<8x8xf32> to vector<8x8xbf16>
    %cst_7 = arith.constant dense<0.000000e+00> : vector<8x16xf32>
    %22 = tpu.matmul %21, %5, %cst_7 {dimension_numbers = #tpu.dot_dimension_numbers<[1], [0], [0], [1], [0, 0, 1, 1], [], []>} : vector<8x8xbf16>, vector<8x16xbf16>, vector<8x16xf32> -> vector<8x16xf32>
    %23 = vector.extract_strided_slice %0 {offsets = [0, 16], sizes = [8, 16], strides = [1, 1]} : vector<8x192xbf16> to vector<8x16xbf16>
    %24 = vector.extract_strided_slice %0 {offsets = [0, 80], sizes = [8, 16], strides = [1, 1]} : vector<8x192xbf16> to vector<8x16xbf16>
    %25 = vector.extract_strided_slice %0 {offsets = [0, 144], sizes = [8, 16], strides = [1, 1]} : vector<8x192xbf16> to vector<8x16xbf16>
    %cst_8 = arith.constant dense<0.000000e+00> : vector<8x8xf32>
    %26 = tpu.matmul %23, %24, %cst_8 {dimension_numbers = #tpu.dot_dimension_numbers<[1], [1], [0], [0], [0, 0, 1, 0], [], []>} : vector<8x16xbf16>, vector<8x16xbf16>, vector<8x8xf32> -> vector<8x8xf32>
    %cst_9 = arith.constant 2.500000e-01 : f32
    %27 = vector.broadcast %cst_9 : f32 to vector<8x8xf32>
    %28 = arith.mulf %26, %27 : vector<8x8xf32>
    %29 = vector.broadcast %2 : vector<1x8xf32> to vector<8x8xf32>
    %30 = arith.addf %28, %29 : vector<8x8xf32>
    %cst_10 = arith.constant dense<0xFF800000> : vector<8xf32>
    %31 = vector.multi_reduction <maximumf>, %30, %cst_10 [1] : vector<8x8xf32> to vector<8xf32>
    %32 = vector.shape_cast %31 : vector<8xf32> to vector<8x1xf32>
    %33 = vector.broadcast %32 : vector<8x1xf32> to vector<8x8xf32>
    %34 = arith.subf %30, %33 : vector<8x8xf32>
    %35 = math.exp %34 : vector<8x8xf32>
    %cst_11 = arith.constant dense<0.000000e+00> : vector<8xf32>
    %36 = vector.multi_reduction <add>, %35, %cst_11 [1] : vector<8x8xf32> to vector<8xf32>
    %37 = vector.shape_cast %36 : vector<8xf32> to vector<8x1xf32>
    %38 = tpu.reciprocal %37 {approx = true} : vector<8x1xf32> -> vector<8x1xf32>
    %39 = vector.broadcast %38 : vector<8x1xf32> to vector<8x8xf32>
    %40 = arith.mulf %35, %39 : vector<8x8xf32>
    %41 = arith.truncf %40 : vector<8x8xf32> to vector<8x8xbf16>
    %cst_12 = arith.constant dense<0.000000e+00> : vector<8x16xf32>
    %42 = tpu.matmul %41, %25, %cst_12 {dimension_numbers = #tpu.dot_dimension_numbers<[1], [0], [0], [1], [0, 0, 1, 1], [], []>} : vector<8x8xbf16>, vector<8x16xbf16>, vector<8x16xf32> -> vector<8x16xf32>
    %43 = vector.extract_strided_slice %0 {offsets = [0, 32], sizes = [8, 16], strides = [1, 1]} : vector<8x192xbf16> to vector<8x16xbf16>
    %44 = vector.extract_strided_slice %0 {offsets = [0, 96], sizes = [8, 16], strides = [1, 1]} : vector<8x192xbf16> to vector<8x16xbf16>
    %45 = vector.extract_strided_slice %0 {offsets = [0, 160], sizes = [8, 16], strides = [1, 1]} : vector<8x192xbf16> to vector<8x16xbf16>
    %cst_13 = arith.constant dense<0.000000e+00> : vector<8x8xf32>
    %46 = tpu.matmul %43, %44, %cst_13 {dimension_numbers = #tpu.dot_dimension_numbers<[1], [1], [0], [0], [0, 0, 1, 0], [], []>} : vector<8x16xbf16>, vector<8x16xbf16>, vector<8x8xf32> -> vector<8x8xf32>
    %cst_14 = arith.constant 2.500000e-01 : f32
    %47 = vector.broadcast %cst_14 : f32 to vector<8x8xf32>
    %48 = arith.mulf %46, %47 : vector<8x8xf32>
    %49 = vector.broadcast %2 : vector<1x8xf32> to vector<8x8xf32>
    %50 = arith.addf %48, %49 : vector<8x8xf32>
    %cst_15 = arith.constant dense<0xFF800000> : vector<8xf32>
    %51 = vector.multi_reduction <maximumf>, %50, %cst_15 [1] : vector<8x8xf32> to vector<8xf32>
    %52 = vector.shape_cast %51 : vector<8xf32> to vector<8x1xf32>
    %53 = vector.broadcast %52 : vector<8x1xf32> to vector<8x8xf32>
    %54 = arith.subf %50, %53 : vector<8x8xf32>
    %55 = math.exp %54 : vector<8x8xf32>
    %cst_16 = arith.constant dense<0.000000e+00> : vector<8xf32>
    %56 = vector.multi_reduction <add>, %55, %cst_16 [1] : vector<8x8xf32> to vector<8xf32>
    %57 = vector.shape_cast %56 : vector<8xf32> to vector<8x1xf32>
    %58 = tpu.reciprocal %57 {approx = true} : vector<8x1xf32> -> vector<8x1xf32>
    %59 = vector.broadcast %58 : vector<8x1xf32> to vector<8x8xf32>
    %60 = arith.mulf %55, %59 : vector<8x8xf32>
    %61 = arith.truncf %60 : vector<8x8xf32> to vector<8x8xbf16>
    %cst_17 = arith.constant dense<0.000000e+00> : vector<8x16xf32>
    %62 = tpu.matmul %61, %45, %cst_17 {dimension_numbers = #tpu.dot_dimension_numbers<[1], [0], [0], [1], [0, 0, 1, 1], [], []>} : vector<8x8xbf16>, vector<8x16xbf16>, vector<8x16xf32> -> vector<8x16xf32>
    %63 = vector.extract_strided_slice %0 {offsets = [0, 48], sizes = [8, 16], strides = [1, 1]} : vector<8x192xbf16> to vector<8x16xbf16>
    %64 = vector.extract_strided_slice %0 {offsets = [0, 112], sizes = [8, 16], strides = [1, 1]} : vector<8x192xbf16> to vector<8x16xbf16>
    %65 = vector.extract_strided_slice %0 {offsets = [0, 176], sizes = [8, 16], strides = [1, 1]} : vector<8x192xbf16> to vector<8x16xbf16>
    %cst_18 = arith.constant dense<0.000000e+00> : vector<8x8xf32>
    %66 = tpu.matmul %63, %64, %cst_18 {dimension_numbers = #tpu.dot_dimension_numbers<[1], [1], [0], [0], [0, 0, 1, 0], [], []>} : vector<8x16xbf16>, vector<8x16xbf16>, vector<8x8xf32> -> vector<8x8xf32>
    %cst_19 = arith.constant 2.500000e-01 : f32
    %67 = vector.broadcast %cst_19 : f32 to vector<8x8xf32>
    %68 = arith.mulf %66, %67 : vector<8x8xf32>
    %69 = vector.broadcast %2 : vector<1x8xf32> to vector<8x8xf32>
    %70 = arith.addf %68, %69 : vector<8x8xf32>
    %cst_20 = arith.constant dense<0xFF800000> : vector<8xf32>
    %71 = vector.multi_reduction <maximumf>, %70, %cst_20 [1] : vector<8x8xf32> to vector<8xf32>
    %72 = vector.shape_cast %71 : vector<8xf32> to vector<8x1xf32>
    %73 = vector.broadcast %72 : vector<8x1xf32> to vector<8x8xf32>
    %74 = arith.subf %70, %73 : vector<8x8xf32>
    %75 = math.exp %74 : vector<8x8xf32>
    %cst_21 = arith.constant dense<0.000000e+00> : vector<8xf32>
    %76 = vector.multi_reduction <add>, %75, %cst_21 [1] : vector<8x8xf32> to vector<8xf32>
    %77 = vector.shape_cast %76 : vector<8xf32> to vector<8x1xf32>
    %78 = tpu.reciprocal %77 {approx = true} : vector<8x1xf32> -> vector<8x1xf32>
    %79 = vector.broadcast %78 : vector<8x1xf32> to vector<8x8xf32>
    %80 = arith.mulf %75, %79 : vector<8x8xf32>
    %81 = arith.truncf %80 : vector<8x8xf32> to vector<8x8xbf16>
    %cst_22 = arith.constant dense<0.000000e+00> : vector<8x16xf32>
    %82 = tpu.matmul %81, %65, %cst_22 {dimension_numbers = #tpu.dot_dimension_numbers<[1], [0], [0], [1], [0, 0, 1, 1], [], []>} : vector<8x8xbf16>, vector<8x16xbf16>, vector<8x16xf32> -> vector<8x16xf32>
    %83 = tpu.concatenate %22, %42, %62, %82 in 1 : vector<8x16xf32>, vector<8x16xf32>, vector<8x16xf32>, vector<8x16xf32> -> vector<8x64xf32>
    %84 = arith.truncf %83 : vector<8x64xf32> to vector<8x64xbf16>
    %c0_23 = arith.constant 0 : index
    %c0_24 = arith.constant 0 : index
    %85 = vector.load %arg3[%c0_23, %c0_24] : memref<8x64xbf16, #tpu.memory_space<vmem>>, vector<8x64xbf16>
    tpu.vector_store %arg3[%c0_23, %c0_24], %84 {strides = array<i32>} : memref<8x64xbf16, #tpu.memory_space<vmem>>, vector<8x64xbf16>,
    return
  }
  func.func @transform_0(%arg0: i32) -> (i32, i32) {
    %c0_i32 = arith.constant 0 : i32
    %c0_i32_0 = arith.constant 0 : i32
    return %arg0, %c0_i32 : i32, i32
  }
  func.func @transform_1(%arg0: i32) -> (i32, i32, i32) {
    %c0_i32 = arith.constant 0 : i32
    %c0_i32_0 = arith.constant 0 : i32
    %c0_i32_1 = arith.constant 0 : i32
    return %arg0, %c0_i32, %c0_i32_0 : i32, i32, i32
  }
  func.func @transform_2(%arg0: i32) -> (i32, i32) {
    %c0_i32 = arith.constant 0 : i32
    %c0_i32_0 = arith.constant 0 : i32
    return %arg0, %c0_i32 : i32, i32
  }
}

module attributes {stable_mosaic.version = 11 : i64} {
  func.func @_dense_add_ln_kernel(%arg0: i32, %arg1: memref<16x64xbf16, #tpu.memory_space<vmem>>, %arg2: memref<64x64xbf16, #tpu.memory_space<vmem>>, %arg3: memref<1x64xf32, #tpu.memory_space<vmem>>, %arg4: memref<16x64xbf16, #tpu.memory_space<vmem>>, %arg5: memref<1x64xf32, #tpu.memory_space<vmem>>, %arg6: memref<1x64xf32, #tpu.memory_space<vmem>>, %arg7: memref<16x64xbf16, #tpu.memory_space<vmem>>) attributes {dimension_semantics = [#tpu.dimension_semantics<parallel>], iteration_bounds = array<i64: 1>, scalar_prefetch = 0 : i64, scratch_operands = 0 : i64, tpu.core_type = #tpu.core_type<tc>, window_params = [{transform_indices = @transform_0, window_bounds = array<i64: 16, 64>}, {pipeline_mode = #tpu.pipeline_mode<synchronous>, transform_indices = @transform_1, window_bounds = array<i64: 64, 64>}, {pipeline_mode = #tpu.pipeline_mode<synchronous>, transform_indices = @transform_2, window_bounds = array<i64: 1, 64>}, {transform_indices = @transform_3, window_bounds = array<i64: 16, 64>}, {pipeline_mode = #tpu.pipeline_mode<synchronous>, transform_indices = @transform_4, window_bounds = array<i64: 1, 64>}, {pipeline_mode = #tpu.pipeline_mode<synchronous>, transform_indices = @transform_5, window_bounds = array<i64: 1, 64>}, {transform_indices = @transform_6, window_bounds = array<i64: 16, 64>}]} {
    %c0 = arith.constant 0 : index
    %c0_0 = arith.constant 0 : index
    %0 = vector.load %arg1[%c0, %c0_0] : memref<16x64xbf16, #tpu.memory_space<vmem>>, vector<16x64xbf16>
    %c0_1 = arith.constant 0 : index
    %c0_2 = arith.constant 0 : index
    %1 = vector.load %arg2[%c0_1, %c0_2] : memref<64x64xbf16, #tpu.memory_space<vmem>>, vector<64x64xbf16>
    %cst = arith.constant dense<0.000000e+00> : vector<16x64xf32>
    %2 = tpu.matmul %0, %1, %cst {dimension_numbers = #tpu.dot_dimension_numbers<[1], [0], [0], [1], [0, 0, 1, 1], [], []>} : vector<16x64xbf16>, vector<64x64xbf16>, vector<16x64xf32> -> vector<16x64xf32>
    %c0_3 = arith.constant 0 : index
    %c0_4 = arith.constant 0 : index
    %3 = vector.load %arg3[%c0_3, %c0_4] : memref<1x64xf32, #tpu.memory_space<vmem>>, vector<1x64xf32>
    %4 = vector.broadcast %3 : vector<1x64xf32> to vector<16x64xf32>
    %5 = arith.addf %2, %4 : vector<16x64xf32>
    %c0_5 = arith.constant 0 : index
    %c0_6 = arith.constant 0 : index
    %6 = vector.load %arg4[%c0_5, %c0_6] : memref<16x64xbf16, #tpu.memory_space<vmem>>, vector<16x64xbf16>
    %7 = arith.extf %6 : vector<16x64xbf16> to vector<16x64xf32>
    %8 = arith.addf %5, %7 : vector<16x64xf32>
    %cst_7 = arith.constant dense<0.000000e+00> : vector<16xf32>
    %9 = vector.multi_reduction <add>, %8, %cst_7 [1] : vector<16x64xf32> to vector<16xf32>
    %10 = vector.shape_cast %9 : vector<16xf32> to vector<16x1xf32>
    %cst_8 = arith.constant 6.400000e+01 : f32
    %11 = vector.broadcast %cst_8 : f32 to vector<16x1xf32>
    %12 = arith.divf %10, %11 : vector<16x1xf32>
    %13 = vector.broadcast %12 : vector<16x1xf32> to vector<16x64xf32>
    %14 = arith.subf %8, %13 : vector<16x64xf32>
    %15 = arith.mulf %14, %14 : vector<16x64xf32>
    %cst_9 = arith.constant dense<0.000000e+00> : vector<16xf32>
    %16 = vector.multi_reduction <add>, %15, %cst_9 [1] : vector<16x64xf32> to vector<16xf32>
    %17 = vector.shape_cast %16 : vector<16xf32> to vector<16x1xf32>
    %cst_10 = arith.constant 6.400000e+01 : f32
    %18 = vector.broadcast %cst_10 : f32 to vector<16x1xf32>
    %19 = arith.divf %17, %18 : vector<16x1xf32>
    %cst_11 = arith.constant 9.99999996E-13 : f32
    %20 = vector.broadcast %cst_11 : f32 to vector<16x1xf32>
    %21 = arith.addf %19, %20 : vector<16x1xf32>
    %22 = math.rsqrt %21 : vector<16x1xf32>
    %23 = vector.broadcast %22 : vector<16x1xf32> to vector<16x64xf32>
    %24 = arith.mulf %14, %23 : vector<16x64xf32>
    %c0_12 = arith.constant 0 : index
    %c0_13 = arith.constant 0 : index
    %25 = vector.load %arg5[%c0_12, %c0_13] : memref<1x64xf32, #tpu.memory_space<vmem>>, vector<1x64xf32>
    %26 = vector.broadcast %25 : vector<1x64xf32> to vector<16x64xf32>
    %27 = arith.mulf %24, %26 : vector<16x64xf32>
    %c0_14 = arith.constant 0 : index
    %c0_15 = arith.constant 0 : index
    %28 = vector.load %arg6[%c0_14, %c0_15] : memref<1x64xf32, #tpu.memory_space<vmem>>, vector<1x64xf32>
    %29 = vector.broadcast %28 : vector<1x64xf32> to vector<16x64xf32>
    %30 = arith.addf %27, %29 : vector<16x64xf32>
    %31 = arith.truncf %30 : vector<16x64xf32> to vector<16x64xbf16>
    %c0_16 = arith.constant 0 : index
    %c0_17 = arith.constant 0 : index
    %32 = vector.load %arg7[%c0_16, %c0_17] : memref<16x64xbf16, #tpu.memory_space<vmem>>, vector<16x64xbf16>
    tpu.vector_store %arg7[%c0_16, %c0_17], %31 {strides = array<i32>} : memref<16x64xbf16, #tpu.memory_space<vmem>>, vector<16x64xbf16>,
    return
  }
  func.func @transform_0(%arg0: i32) -> (i32, i32) {
    %c0_i32 = arith.constant 0 : i32
    %c0_i32_0 = arith.constant 0 : i32
    return %arg0, %c0_i32 : i32, i32
  }
  func.func @transform_1(%arg0: i32) -> (i32, i32) {
    %c0_i32 = arith.constant 0 : i32
    %c0_i32_0 = arith.constant 0 : i32
    %c0_i32_1 = arith.constant 0 : i32
    return %c0_i32, %c0_i32_0 : i32, i32
  }
  func.func @transform_2(%arg0: i32) -> (i32, i32) {
    %c0_i32 = arith.constant 0 : i32
    %c0_i32_0 = arith.constant 0 : i32
    %c0_i32_1 = arith.constant 0 : i32
    return %c0_i32, %c0_i32_0 : i32, i32
  }
  func.func @transform_3(%arg0: i32) -> (i32, i32) {
    %c0_i32 = arith.constant 0 : i32
    %c0_i32_0 = arith.constant 0 : i32
    return %arg0, %c0_i32 : i32, i32
  }
  func.func @transform_4(%arg0: i32) -> (i32, i32) {
    %c0_i32 = arith.constant 0 : i32
    %c0_i32_0 = arith.constant 0 : i32
    %c0_i32_1 = arith.constant 0 : i32
    return %c0_i32, %c0_i32_0 : i32, i32
  }
  func.func @transform_5(%arg0: i32) -> (i32, i32) {
    %c0_i32 = arith.constant 0 : i32
    %c0_i32_0 = arith.constant 0 : i32
    %c0_i32_1 = arith.constant 0 : i32
    return %c0_i32, %c0_i32_0 : i32, i32
  }
  func.func @transform_6(%arg0: i32) -> (i32, i32) {
    %c0_i32 = arith.constant 0 : i32
    %c0_i32_0 = arith.constant 0 : i32
    return %arg0, %c0_i32 : i32, i32
  }
}

module attributes {stable_mosaic.version = 11 : i64} {
  func.func @_ffn_kernel(%arg0: i32, %arg1: i32, %arg2: memref<16x64xbf16, #tpu.memory_space<vmem>>, %arg3: memref<64x512xbf16, #tpu.memory_space<vmem>>, %arg4: memref<1x512xf32, #tpu.memory_space<vmem>>, %arg5: memref<512x64xbf16, #tpu.memory_space<vmem>>, %arg6: memref<1x64xf32, #tpu.memory_space<vmem>>, %arg7: memref<1x64xf32, #tpu.memory_space<vmem>>, %arg8: memref<1x64xf32, #tpu.memory_space<vmem>>, %arg9: memref<16x64xbf16, #tpu.memory_space<vmem>>, %arg10: memref<16x64xf32, #tpu.memory_space<vmem>>) attributes {dimension_semantics = [#tpu.dimension_semantics<parallel>, #tpu.dimension_semantics<arbitrary>], iteration_bounds = array<i64: 1, 2>, scalar_prefetch = 0 : i64, scratch_operands = 1 : i64, tpu.core_type = #tpu.core_type<tc>, window_params = [{transform_indices = @transform_0, window_bounds = array<i64: 16, 64>}, {transform_indices = @transform_1, window_bounds = array<i64: 64, 512>}, {transform_indices = @transform_2, window_bounds = array<i64: 1, 512>}, {transform_indices = @transform_3, window_bounds = array<i64: 512, 64>}, {pipeline_mode = #tpu.pipeline_mode<synchronous>, transform_indices = @transform_4, window_bounds = array<i64: 1, 64>}, {pipeline_mode = #tpu.pipeline_mode<synchronous>, transform_indices = @transform_5, window_bounds = array<i64: 1, 64>}, {pipeline_mode = #tpu.pipeline_mode<synchronous>, transform_indices = @transform_6, window_bounds = array<i64: 1, 64>}, {transform_indices = @transform_7, window_bounds = array<i64: 16, 64>}]} {
    %c0_i32 = arith.constant 0 : i32
    %0 = arith.cmpi eq, %arg1, %c0_i32 : i32
    %1 = arith.extui %0 : i1 to i32
    %c0_i32_0 = arith.constant 0 : i32
    %2 = arith.cmpi ne, %1, %c0_i32_0 : i32
    scf.if %2 {
      %cst_18 = arith.constant 0.000000e+00 : f32
      %31 = vector.broadcast %cst_18 : f32 to vector<16x64xf32>
      %c0_19 = arith.constant 0 : index
      %c0_20 = arith.constant 0 : index
      %32 = vector.load %arg10[%c0_19, %c0_20] : memref<16x64xf32, #tpu.memory_space<vmem>>, vector<16x64xf32>
      tpu.vector_store %arg10[%c0_19, %c0_20], %31 {strides = array<i32>} : memref<16x64xf32, #tpu.memory_space<vmem>>, vector<16x64xf32>,
    } else {
    }
    %c0 = arith.constant 0 : index
    %c0_1 = arith.constant 0 : index
    %3 = vector.load %arg2[%c0, %c0_1] : memref<16x64xbf16, #tpu.memory_space<vmem>>, vector<16x64xbf16>
    %c0_2 = arith.constant 0 : index
    %c0_3 = arith.constant 0 : index
    %4 = vector.load %arg3[%c0_2, %c0_3] : memref<64x512xbf16, #tpu.memory_space<vmem>>, vector<64x512xbf16>
    %cst = arith.constant dense<0.000000e+00> : vector<16x512xf32>
    %5 = tpu.matmul %3, %4, %cst {dimension_numbers = #tpu.dot_dimension_numbers<[1], [0], [0], [1], [0, 0, 1, 1], [], []>} : vector<16x64xbf16>, vector<64x512xbf16>, vector<16x512xf32> -> vector<16x512xf32>
    %c0_4 = arith.constant 0 : index
    %c0_5 = arith.constant 0 : index
    %6 = vector.load %arg4[%c0_4, %c0_5] : memref<1x512xf32, #tpu.memory_space<vmem>>, vector<1x512xf32>
    %7 = vector.broadcast %6 : vector<1x512xf32> to vector<16x512xf32>
    %8 = arith.addf %5, %7 : vector<16x512xf32>
    %9 = arith.mulf %8, %8 : vector<16x512xf32>
    %10 = arith.mulf %8, %9 : vector<16x512xf32>
    %cst_6 = arith.constant 4.471500e-02 : f32
    %11 = vector.broadcast %cst_6 : f32 to vector<16x512xf32>
    %12 = arith.mulf %11, %10 : vector<16x512xf32>
    %13 = arith.addf %8, %12 : vector<16x512xf32>
    %cst_7 = arith.constant 0.797884583 : f32
    %14 = vector.broadcast %cst_7 : f32 to vector<16x512xf32>
    %15 = arith.mulf %14, %13 : vector<16x512xf32>
    %16 = math.tanh %15 : vector<16x512xf32>
    %cst_8 = arith.constant 1.000000e+00 : f32
    %17 = vector.broadcast %cst_8 : f32 to vector<16x512xf32>
    %18 = arith.addf %17, %16 : vector<16x512xf32>
    %cst_9 = arith.constant 5.000000e-01 : f32
    %19 = vector.broadcast %cst_9 : f32 to vector<16x512xf32>
    %20 = arith.mulf %19, %18 : vector<16x512xf32>
    %21 = arith.mulf %8, %20 : vector<16x512xf32>
    %c0_10 = arith.constant 0 : index
    %c0_11 = arith.constant 0 : index
    %22 = vector.load %arg10[%c0_10, %c0_11] : memref<16x64xf32, #tpu.memory_space<vmem>>, vector<16x64xf32>
    %23 = arith.truncf %21 : vector<16x512xf32> to vector<16x512xbf16>
    %c0_12 = arith.constant 0 : index
    %c0_13 = arith.constant 0 : index
    %24 = vector.load %arg5[%c0_12, %c0_13] : memref<512x64xbf16, #tpu.memory_space<vmem>>, vector<512x64xbf16>
    %cst_14 = arith.constant dense<0.000000e+00> : vector<16x64xf32>
    %25 = tpu.matmul %23, %24, %cst_14 {dimension_numbers = #tpu.dot_dimension_numbers<[1], [0], [0], [1], [0, 0, 1, 1], [], []>} : vector<16x512xbf16>, vector<512x64xbf16>, vector<16x64xf32> -> vector<16x64xf32>
    %26 = arith.addf %22, %25 : vector<16x64xf32>
    %c0_15 = arith.constant 0 : index
    %c0_16 = arith.constant 0 : index
    %27 = vector.load %arg10[%c0_15, %c0_16] : memref<16x64xf32, #tpu.memory_space<vmem>>, vector<16x64xf32>
    tpu.vector_store %arg10[%c0_15, %c0_16], %26 {strides = array<i32>} : memref<16x64xf32, #tpu.memory_space<vmem>>, vector<16x64xf32>,
    %c1_i32 = arith.constant 1 : i32
    %28 = arith.cmpi eq, %arg1, %c1_i32 : i32
    %29 = arith.extui %28 : i1 to i32
    %c0_i32_17 = arith.constant 0 : i32
    %30 = arith.cmpi ne, %29, %c0_i32_17 : i32
    scf.if %30 {
      %c0_18 = arith.constant 0 : index
      %c0_19 = arith.constant 0 : index
      %31 = vector.load %arg10[%c0_18, %c0_19] : memref<16x64xf32, #tpu.memory_space<vmem>>, vector<16x64xf32>
      %c0_20 = arith.constant 0 : index
      %c0_21 = arith.constant 0 : index
      %32 = vector.load %arg6[%c0_20, %c0_21] : memref<1x64xf32, #tpu.memory_space<vmem>>, vector<1x64xf32>
      %33 = vector.broadcast %32 : vector<1x64xf32> to vector<16x64xf32>
      %34 = arith.addf %31, %33 : vector<16x64xf32>
      %c0_22 = arith.constant 0 : index
      %c0_23 = arith.constant 0 : index
      %35 = vector.load %arg2[%c0_22, %c0_23] : memref<16x64xbf16, #tpu.memory_space<vmem>>, vector<16x64xbf16>
      %36 = arith.extf %35 : vector<16x64xbf16> to vector<16x64xf32>
      %37 = arith.addf %34, %36 : vector<16x64xf32>
      %cst_24 = arith.constant dense<0.000000e+00> : vector<16xf32>
      %38 = vector.multi_reduction <add>, %37, %cst_24 [1] : vector<16x64xf32> to vector<16xf32>
      %39 = vector.shape_cast %38 : vector<16xf32> to vector<16x1xf32>
      %cst_25 = arith.constant 6.400000e+01 : f32
      %40 = vector.broadcast %cst_25 : f32 to vector<16x1xf32>
      %41 = arith.divf %39, %40 : vector<16x1xf32>
      %42 = vector.broadcast %41 : vector<16x1xf32> to vector<16x64xf32>
      %43 = arith.subf %37, %42 : vector<16x64xf32>
      %44 = arith.mulf %43, %43 : vector<16x64xf32>
      %cst_26 = arith.constant dense<0.000000e+00> : vector<16xf32>
      %45 = vector.multi_reduction <add>, %44, %cst_26 [1] : vector<16x64xf32> to vector<16xf32>
      %46 = vector.shape_cast %45 : vector<16xf32> to vector<16x1xf32>
      %cst_27 = arith.constant 6.400000e+01 : f32
      %47 = vector.broadcast %cst_27 : f32 to vector<16x1xf32>
      %48 = arith.divf %46, %47 : vector<16x1xf32>
      %cst_28 = arith.constant 9.99999996E-13 : f32
      %49 = vector.broadcast %cst_28 : f32 to vector<16x1xf32>
      %50 = arith.addf %48, %49 : vector<16x1xf32>
      %51 = math.rsqrt %50 : vector<16x1xf32>
      %52 = vector.broadcast %51 : vector<16x1xf32> to vector<16x64xf32>
      %53 = arith.mulf %43, %52 : vector<16x64xf32>
      %c0_29 = arith.constant 0 : index
      %c0_30 = arith.constant 0 : index
      %54 = vector.load %arg7[%c0_29, %c0_30] : memref<1x64xf32, #tpu.memory_space<vmem>>, vector<1x64xf32>
      %55 = vector.broadcast %54 : vector<1x64xf32> to vector<16x64xf32>
      %56 = arith.mulf %53, %55 : vector<16x64xf32>
      %c0_31 = arith.constant 0 : index
      %c0_32 = arith.constant 0 : index
      %57 = vector.load %arg8[%c0_31, %c0_32] : memref<1x64xf32, #tpu.memory_space<vmem>>, vector<1x64xf32>
      %58 = vector.broadcast %57 : vector<1x64xf32> to vector<16x64xf32>
      %59 = arith.addf %56, %58 : vector<16x64xf32>
      %60 = arith.truncf %59 : vector<16x64xf32> to vector<16x64xbf16>
      %c0_33 = arith.constant 0 : index
      %c0_34 = arith.constant 0 : index
      %61 = vector.load %arg9[%c0_33, %c0_34] : memref<16x64xbf16, #tpu.memory_space<vmem>>, vector<16x64xbf16>
      tpu.vector_store %arg9[%c0_33, %c0_34], %60 {strides = array<i32>} : memref<16x64xbf16, #tpu.memory_space<vmem>>, vector<16x64xbf16>,
    } else {
    }
    return
  }
  func.func @transform_0(%arg0: i32, %arg1: i32) -> (i32, i32) {
    %c0_i32 = arith.constant 0 : i32
    %c0_i32_0 = arith.constant 0 : i32
    return %arg0, %c0_i32 : i32, i32
  }
  func.func @transform_1(%arg0: i32, %arg1: i32) -> (i32, i32) {
    %c0_i32 = arith.constant 0 : i32
    %c0_i32_0 = arith.constant 0 : i32
    return %c0_i32, %arg1 : i32, i32
  }
  func.func @transform_2(%arg0: i32, %arg1: i32) -> (i32, i32) {
    %c0_i32 = arith.constant 0 : i32
    %c0_i32_0 = arith.constant 0 : i32
    return %c0_i32, %arg1 : i32, i32
  }
  func.func @transform_3(%arg0: i32, %arg1: i32) -> (i32, i32) {
    %c0_i32 = arith.constant 0 : i32
    %c0_i32_0 = arith.constant 0 : i32
    return %arg1, %c0_i32 : i32, i32
  }
  func.func @transform_4(%arg0: i32, %arg1: i32) -> (i32, i32) {
    %c0_i32 = arith.constant 0 : i32
    %c0_i32_0 = arith.constant 0 : i32
    %c0_i32_1 = arith.constant 0 : i32
    return %c0_i32, %c0_i32_0 : i32, i32
  }
  func.func @transform_5(%arg0: i32, %arg1: i32) -> (i32, i32) {
    %c0_i32 = arith.constant 0 : i32
    %c0_i32_0 = arith.constant 0 : i32
    %c0_i32_1 = arith.constant 0 : i32
    return %c0_i32, %c0_i32_0 : i32, i32
  }
  func.func @transform_6(%arg0: i32, %arg1: i32) -> (i32, i32) {
    %c0_i32 = arith.constant 0 : i32
    %c0_i32_0 = arith.constant 0 : i32
    %c0_i32_1 = arith.constant 0 : i32
    return %c0_i32, %c0_i32_0 : i32, i32
  }
  func.func @transform_7(%arg0: i32, %arg1: i32) -> (i32, i32) {
    %c0_i32 = arith.constant 0 : i32
    %c0_i32_0 = arith.constant 0 : i32
    return %arg0, %c0_i32 : i32, i32
  }
}

module attributes {stable_mosaic.version = 11 : i64} {
  func.func @_pool_cls_kernel(%arg0: i32, %arg1: memref<2x64xbf16, #tpu.memory_space<vmem>>, %arg2: memref<64x64xbf16, #tpu.memory_space<vmem>>, %arg3: memref<1x64xf32, #tpu.memory_space<vmem>>, %arg4: memref<64x8xbf16, #tpu.memory_space<vmem>>, %arg5: memref<1x8xf32, #tpu.memory_space<vmem>>, %arg6: memref<2x8xf32, #tpu.memory_space<vmem>>) attributes {dimension_semantics = [#tpu.dimension_semantics<arbitrary>], iteration_bounds = array<i64: 1>, scalar_prefetch = 0 : i64, scratch_operands = 0 : i64, tpu.core_type = #tpu.core_type<tc>, window_params = [{pipeline_mode = #tpu.pipeline_mode<synchronous>, transform_indices = @transform_0, window_bounds = array<i64: 2, 64>}, {pipeline_mode = #tpu.pipeline_mode<synchronous>, transform_indices = @transform_1, window_bounds = array<i64: 64, 64>}, {pipeline_mode = #tpu.pipeline_mode<synchronous>, transform_indices = @transform_2, window_bounds = array<i64: 1, 64>}, {pipeline_mode = #tpu.pipeline_mode<synchronous>, transform_indices = @transform_3, window_bounds = array<i64: 64, 8>}, {pipeline_mode = #tpu.pipeline_mode<synchronous>, transform_indices = @transform_4, window_bounds = array<i64: 1, 8>}, {pipeline_mode = #tpu.pipeline_mode<synchronous>, transform_indices = @transform_5, window_bounds = array<i64: 2, 8>}]} {
    %c0 = arith.constant 0 : index
    %c0_0 = arith.constant 0 : index
    %0 = vector.load %arg1[%c0, %c0_0] : memref<2x64xbf16, #tpu.memory_space<vmem>>, vector<2x64xbf16>
    %c0_1 = arith.constant 0 : index
    %c0_2 = arith.constant 0 : index
    %1 = vector.load %arg2[%c0_1, %c0_2] : memref<64x64xbf16, #tpu.memory_space<vmem>>, vector<64x64xbf16>
    %cst = arith.constant dense<0.000000e+00> : vector<2x64xf32>
    %2 = tpu.matmul %0, %1, %cst {dimension_numbers = #tpu.dot_dimension_numbers<[1], [0], [0], [1], [0, 0, 1, 1], [], []>} : vector<2x64xbf16>, vector<64x64xbf16>, vector<2x64xf32> -> vector<2x64xf32>
    %c0_3 = arith.constant 0 : index
    %c0_4 = arith.constant 0 : index
    %3 = vector.load %arg3[%c0_3, %c0_4] : memref<1x64xf32, #tpu.memory_space<vmem>>, vector<1x64xf32>
    %4 = vector.broadcast %3 : vector<1x64xf32> to vector<2x64xf32>
    %5 = arith.addf %2, %4 : vector<2x64xf32>
    %6 = math.tanh %5 : vector<2x64xf32>
    %7 = arith.truncf %6 : vector<2x64xf32> to vector<2x64xbf16>
    %c0_5 = arith.constant 0 : index
    %c0_6 = arith.constant 0 : index
    %8 = vector.load %arg4[%c0_5, %c0_6] : memref<64x8xbf16, #tpu.memory_space<vmem>>, vector<64x8xbf16>
    %cst_7 = arith.constant dense<0.000000e+00> : vector<2x8xf32>
    %9 = tpu.matmul %7, %8, %cst_7 {dimension_numbers = #tpu.dot_dimension_numbers<[1], [0], [0], [1], [0, 0, 1, 1], [], []>} : vector<2x64xbf16>, vector<64x8xbf16>, vector<2x8xf32> -> vector<2x8xf32>
    %c0_8 = arith.constant 0 : index
    %c0_9 = arith.constant 0 : index
    %10 = vector.load %arg5[%c0_8, %c0_9] : memref<1x8xf32, #tpu.memory_space<vmem>>, vector<1x8xf32>
    %11 = vector.broadcast %10 : vector<1x8xf32> to vector<2x8xf32>
    %12 = arith.addf %9, %11 : vector<2x8xf32>
    %13 = arith.negf %12 : vector<2x8xf32>
    %14 = math.exp %13 : vector<2x8xf32>
    %cst_10 = arith.constant 1.000000e+00 : f32
    %15 = vector.broadcast %cst_10 : f32 to vector<2x8xf32>
    %16 = arith.addf %15, %14 : vector<2x8xf32>
    %17 = arith.divf %15, %16 : vector<2x8xf32>
    %c0_11 = arith.constant 0 : index
    %c0_12 = arith.constant 0 : index
    %18 = vector.load %arg6[%c0_11, %c0_12] : memref<2x8xf32, #tpu.memory_space<vmem>>, vector<2x8xf32>
    tpu.vector_store %arg6[%c0_11, %c0_12], %17 {strides = array<i32>} : memref<2x8xf32, #tpu.memory_space<vmem>>, vector<2x8xf32>,
    return
  }
  func.func @transform_0(%arg0: i32) -> (i32, i32) {
    %c0_i32 = arith.constant 0 : i32
    %c0_i32_0 = arith.constant 0 : i32
    %c0_i32_1 = arith.constant 0 : i32
    return %c0_i32, %c0_i32_0 : i32, i32
  }
  func.func @transform_1(%arg0: i32) -> (i32, i32) {
    %c0_i32 = arith.constant 0 : i32
    %c0_i32_0 = arith.constant 0 : i32
    %c0_i32_1 = arith.constant 0 : i32
    return %c0_i32, %c0_i32_0 : i32, i32
  }
  func.func @transform_2(%arg0: i32) -> (i32, i32) {
    %c0_i32 = arith.constant 0 : i32
    %c0_i32_0 = arith.constant 0 : i32
    %c0_i32_1 = arith.constant 0 : i32
    return %c0_i32, %c0_i32_0 : i32, i32
  }
  func.func @transform_3(%arg0: i32) -> (i32, i32) {
    %c0_i32 = arith.constant 0 : i32
    %c0_i32_0 = arith.constant 0 : i32
    %c0_i32_1 = arith.constant 0 : i32
    return %c0_i32, %c0_i32_0 : i32, i32
  }
  func.func @transform_4(%arg0: i32) -> (i32, i32) {
    %c0_i32 = arith.constant 0 : i32
    %c0_i32_0 = arith.constant 0 : i32
    %c0_i32_1 = arith.constant 0 : i32
    return %c0_i32, %c0_i32_0 : i32, i32
  }
  func.func @transform_5(%arg0: i32) -> (i32, i32) {
    %c0_i32 = arith.constant 0 : i32
    %c0_i32_0 = arith.constant 0 : i32
    %c0_i32_1 = arith.constant 0 : i32
    return %c0_i32, %c0_i32_0 : i32, i32
  }
}

</mosaic_0001>

<bundles_post_ra>
// kernel: event_detection_forward.11
= control target key start
LH: loop header
LB: loop body
LE: loop exit
PB: predicated region body
PF: predicated region fallthrough
CT: control target
= control target key end

     0   :  { %v178_v1 = vmov 0   ;;  %vm82_vm0 = vcmask 523264   ;;  %v27_v10 = vlaneseq  ;;  %vm141_vm1 = vcmask 1043456   ;;  %s235_s1 = inlined_call_operand.vmem [shape: bf16[64,192], index: 1, kind: input, shape index: {}]   ;;  %s236_s0 = inlined_call_operand.vmem [shape: bf16[16,64], index: 0, kind: input, shape index: {}]   ;;  %s237_s2 = inlined_call_operand.vmem [shape: f32[1,192], index: 2, kind: input, shape index: {}]   ;;  %s238_s3 = inlined_call_operand.vmem [shape: bf16[16,192], index: 3, kind: output, shape index: {}]  }
   0x1   :  { %v165_v0 = vld [vmem:[%s235_s1 + $0x4] ss:$8 sps:$4 sm:$0xff]   ;;  %118 = vmatprep.mubr.bf16.mxu0 %v178_v1  ;;  %v167_v2 = vld [vmem:[%s235_s1] ss:$8 sps:$4 sm:$0xff]   ;;  %v168_v3 = vld [vmem:[%s235_s1 + $0x14] ss:$8 sps:$4 sm:$0xff]  }
   0x2   :  { %86 = vmatprep.subr.bf16.mxu0 %v165_v0  ;;  %v170_v4 = vld [vmem:[%s235_s1 + $0x10] ss:$8 sps:$4 sm:$0xff]   ;;  %v171_v5 = vld [vmem:[%s235_s1 + $0x24] ss:$8 sps:$4 sm:$0xff]   ;;  %v173_v6 = vld [vmem:[%s235_s1 + $0x20] ss:$8 sps:$4 sm:$0xff]  }
   0x3   :  { %87 = vmatpush1.bf16.msra.mxu0 %v167_v2  ;;  %v174_v7 = vld [vmem:[%s235_s1 + $0x34] ss:$8 sps:$4 sm:$0xff]   ;;  %v176_v8 = vld [vmem:[%s235_s1 + $0x30] ss:$8 sps:$4 sm:$0xff]   ;;  %v177_v9 = vld [vmem:[%s236_s0] sm:$0xff]   ;;  %v28_v11 = vshrl.u32 %v27_v10, 7 }
   0x4   :  { %88 = vmatprep.subr.bf16.mxu0 %v168_v3  ;;  %v25_v13 = vld [vmem:[%s237_s2] sm:$0x3]  ;;  %vm142_vm2 = vcmask 523268  }
   0x5   :  { %v29_v12 = vsub.s32 0, %v28_v11  ;;  %v33_v14 = vsub.s32 1, %v28_v11  ;;  %vm143_vm3 = vmor %vm142_vm2, %vm141_vm1 }
   0x7   :  { %89 = vmatpush1.bf16.msra.mxu0 %v170_v4  ;;  %v30_v15 = vrot.slane %v25_v13, %v29_v12  ;;  %v34_v16 = vrot.slane %v25_v13, %v33_v14 }
   0x8   :  { %90 = vmatprep.subr.bf16.mxu0 %v171_v5 }
   0xb   :  { %91 = vmatpush1.bf16.msra.mxu0 %v173_v6 }
   0xc   :  { %92 = vmatprep.subr.bf16.mxu0 %v174_v7 }
   0xf   :  { %93 = vmatpush1.bf16.msra.mxu0 %v176_v8 }
  0x12   :  { %159 = vmatmul.mubr.msk.bf16.vlgmr.msra.gmra.mrb[0].mxu0 %vm82_vm0, %v177_v9 }
  0xe5   :  { %v120_v17 = vpop.f32.mrb[0].mxu0 }
  0xe6   :  { %v121_v18 = vadd.f32 %v120_v17, %v30_v15  ;;  %v122_v19 = vpop.f32.mrb[1].mxu0 }
  0xe7   :  { %v123_v20 = vadd.f32 %v122_v19, %v34_v16  ;;  %v124_v21 = vpop.f32.mrb[2].mxu0 }
  0xe8   :  { %v125_v22 = vadd.f32 %v124_v21, %v30_v15  ;;  %v126_v23 = vpop.f32.mrb[3].mxu0 }
  0xe9   :  { %v162_v24 = vpack.c.bf16 %v123_v20, %v121_v18  ;;  %v127_v25 = vadd.f32 %v126_v23, %v34_v16 }
  0xeb   :  { %144 = vst.msk [vmem:[%s238_s3] sm:$0xff] %vm143_vm3, %v162_v24  ;;  %v163_v26 = vpack.c.bf16 %v127_v25, %v125_v22 }
  0xed   :  { %145 = vst.msk [vmem:[%s238_s3 + $0x8] sm:$0xff] %vm143_vm3, %v163_v26 }

// kernel: event_detection_forward.10
= control target key start
LH: loop header
LB: loop body
LE: loop exit
PB: predicated region body
PF: predicated region fallthrough
CT: control target
= control target key end

     0   :  { %vm27_vm0 = vcmask 523264   ;;  %vm81_vm1 = vcmask 519168   ;;  %s153_s0 = inlined_call_operand.vmem [shape: bf16[16,64], index: 0, kind: input, shape index: {}]   ;;  %s154_s1 = inlined_call_operand.vmem [shape: bf16[16,64], index: 1, kind: input, shape index: {}]   ;;  %s155_s2 = inlined_call_operand.vmem [shape: f32[1,64], index: 2, kind: input, shape index: {}]   ;;  %s156_s3 = inlined_call_operand.vmem [shape: f32[1,64], index: 3, kind: input, shape index: {}]   ;;  %s157_s4 = inlined_call_operand.vmem [shape: bf16[16,64], index: 4, kind: output, shape index: {}]  }
   0x1   :  { %v95_v0 = vld [vmem:[%s153_s0] sm:$0xff]  }
   0x2   :  { %v99_v1 = vld [vmem:[%s154_s1] sm:$0xff]   ;;  %v96_v2 = vunpack.c.l.bf16 %v95_v0  ;;  %v97_v4 = vunpack.c.h.bf16 %v95_v0 }
   0x3   :  { %v100_v3 = vunpack.c.l.bf16 %v99_v1  ;;  %v101_v5 = vunpack.c.h.bf16 %v99_v1  ;;  %v88_v27 = vld [vmem:[%s155_s2] ss:$0 sm:$0xff] }
   0x4   :  { %v89_v29 = vld [vmem:[%s156_s3] ss:$0 sm:$0xff] }
   0x5   :  { %v25_v6 = vadd.f32 %v100_v3, %v96_v2  ;;  %v26_v7 = vadd.f32 %v101_v5, %v97_v4 }
   0x7   :  { %v28_v8 = vsel %vm27_vm0, %v25_v6, 0.0  ;;  %v31_v9 = vsel %vm27_vm0, %v26_v7, 0.0 }
   0x8   :  { %29 = vadd.xlane.f32.xlu0 %v28_v8 }
   0xc   :  { %32 = vadd.xlane.f32.xlu0 %v31_v9 }
  0x95   :  { %v30_v10 = vpop.xlane.xlu0 %29 }
  0x96   :  { %v35_v11 = vmul.f32 0.015625, %v30_v10 }
  0x98   :  { %v37_v12 = vsub.f32 %v25_v6, %v35_v11 }
  0x99   :  { %v33_v13 = vpop.xlane.xlu0 %32 }
  0x9a   :  { %v36_v14 = vmul.f32 0.015625, %v33_v13  ;;  %v39_v15 = vmul.f32 %v37_v12, %v37_v12 }
  0x9c   :  { %v38_v16 = vsub.f32 %v26_v7, %v36_v14  ;;  %v41_v17 = vsel %vm27_vm0, %v39_v15, 0.0 }
  0x9d   :  { %42 = vadd.xlane.f32.xlu1 %v41_v17 }
  0x9e   :  { %v40_v18 = vmul.f32 %v38_v16, %v38_v16 }
  0xa0   :  { %v44_v19 = vsel %vm27_vm0, %v40_v18, 0.0 }
  0xa1   :  { %45 = vadd.xlane.f32.xlu1 %v44_v19 }
 0x12a   :  { %v43_v20 = vpop.xlane.xlu1 %42 }
 0x12b   :  { %v47_v21 = vmul.f32 0.015625, %v43_v20 }
 0x12d   :  { %v49_v22 = vadd.f32 1e-12, %v47_v21 }
 0x12e   :  { %v46_v23 = vpop.xlane.xlu1 %45 }
 0x12f   :  { %102 = vrsqrt.f32 %v49_v22  ;;  %v48_v24 = vmul.f32 0.015625, %v46_v23 }
 0x131   :  { %v50_v25 = vadd.f32 1e-12, %v48_v24 }
 0x133   :  { %104 = vrsqrt.f32 %v50_v25 }
 0x139   :  { %v103_v26 = vpop.eup %102 }
 0x13a   :  { %v53_v28 = vmul.f32 %v103_v26, %v37_v12 }
 0x13c   :  { %v62_v30 = vmul.f32 %v88_v27, %v53_v28 }
 0x13d   :  { %v105_v31 = vpop.eup %104 }
 0x13e   :  { %v71_v32 = vadd.f32 %v89_v29, %v62_v30  ;;  %v54_v33 = vmul.f32 %v105_v31, %v38_v16 }
 0x140   :  { %v92_v34 = vpack.c.bf16 %v71_v32, %v71_v32  ;;  %v63_v35 = vmul.f32 %v88_v27, %v54_v33 }
 0x142   :  { %82 = vst.msk [vmem:[%s157_s4] sm:$0xf] %vm81_vm1, %v92_v34  ;;  %v72_v36 = vadd.f32 %v89_v29, %v63_v35 }
 0x144   :  { %v93_v37 = vpack.c.bf16 %v72_v36, %v72_v36 }
 0x146   :  { %83 = vst.msk [vmem:[%s157_s4 + $0x4] sm:$0xf] %vm81_vm1, %v93_v37 }

// kernel: event_detection_forward.13
= control target key start
LH: loop header
LB: loop body
LE: loop exit
PB: predicated region body
PF: predicated region fallthrough
CT: control target
= control target key end

     0   :  { %v226_v0 = vmov 0.0   ;;  %vm227_vm0 = vmmov 0   ;;  %vm70_vm1 = vcmask 523264   ;;  %vm174_vm2 = vcmask 519168   ;;  %s301_s1 = inlined_call_operand.vmem [shape: bf16[64,64], index: 1, kind: input, shape index: {}]   ;;  %s302_s0 = inlined_call_operand.vmem [shape: bf16[16,64], index: 0, kind: input, shape index: {}]   ;;  %s303_s3 = inlined_call_operand.vmem [shape: bf16[16,64], index: 3, kind: input, shape index: {}]   ;;  %s304_s2 = inlined_call_operand.vmem [shape: f32[1,64], index: 2, kind: input, shape index: {}]   ;;  %s305_s4 = inlined_call_operand.vmem [shape: f32[1,64], index: 4, kind: input, shape index: {}]   ;;  %s306_s5 = inlined_call_operand.vmem [shape: f32[1,64], index: 5, kind: input, shape index: {}]   ;;  %s307_s6 = inlined_call_operand.vmem [shape: bf16[16,64], index: 6, kind: output, shape index: {}]  }
   0x1   :  { %203 = vmatprep.subr.bf16.mxu0 %v226_v0  ;;  %v217_v1 = vld [vmem:[%s301_s1] sm:$0xff]   ;;  %211 = vmatprep.mubr.msk.bf16.mxu0 %vm227_vm0, %v226_v0  ;;  %v218_v2 = vld [vmem:[%s301_s1 + $0x8] sm:$0xff]   ;;  %v219_v3 = vld [vmem:[%s301_s1 + $0x10] sm:$0xff]  }
   0x2   :  { %204 = vmatpush3.bf16.msra.mxu0 %v217_v1  ;;  %v220_v4 = vld [vmem:[%s301_s1 + $0x18] sm:$0xff]   ;;  %v221_v5 = vld [vmem:[%s302_s0] sm:$0xff]  }
   0x3   :  { %205 = vmatprep.subr.bf16.mxu0 %v226_v0  ;;  %v195_v6 = vld [vmem:[%s303_s3] sm:$0xff]  }
   0x4   :  { %v181_v7 = vld [vmem:[%s304_s2] ss:$0 sm:$0xff]  ;;  %v196_v8 = vunpack.c.l.bf16 %v195_v6  ;;  %v197_v12 = vunpack.c.h.bf16 %v195_v6 }
   0x5   :  { %v188_v37 = vld [vmem:[%s305_s4] ss:$0 sm:$0xff] }
   0x6   :  { %206 = vmatpush3.bf16.msra.mxu0 %v218_v2  ;;  %v189_v39 = vld [vmem:[%s306_s5] ss:$0 sm:$0xff] }
   0x7   :  { %207 = vmatprep.subr.bf16.mxu0 %v226_v0 }
   0xa   :  { %208 = vmatpush3.bf16.msra.mxu0 %v219_v3 }
   0xb   :  { %209 = vmatprep.subr.bf16.mxu0 %v226_v0 }
   0xe   :  { %210 = vmatpush3.bf16.msra.mxu0 %v220_v4 }
  0x11   :  { %212 = vmatmul.mubr.msk.bf16.vlgmr.msra.gmra.mrb[0].mxu0 %vm70_vm1, %v221_v5 }
  0xe4   :  { %v108_v9 = vpop.f32.mrb[0].mxu0 }
  0xe5   :  { %v109_v10 = vadd.f32 %v181_v7, %v108_v9  ;;  %v213_v11 = vpop.f32.mrb[1].mxu0 }
  0xe6   :  { %v111_v13 = vpop.f32.mrb[2].mxu0 }
  0xe7   :  { %v112_v14 = vadd.f32 %v181_v7, %v111_v13  ;;  %v214_v15 = vpop.f32.mrb[3].mxu0  ;;  %v119_v16 = vadd.f32 %v196_v8, %v109_v10 }
  0xe9   :  { %v121_v17 = vsel %vm70_vm1, %v119_v16, 0.0  ;;  %v120_v18 = vadd.f32 %v197_v12, %v112_v14 }
  0xea   :  { %122 = vadd.xlane.f32.xlu0 %v121_v17 }
  0xeb   :  { %v124_v19 = vsel %vm70_vm1, %v120_v18, 0.0 }
  0xee   :  { %125 = vadd.xlane.f32.xlu0 %v124_v19 }
 0x177   :  { %v123_v20 = vpop.xlane.xlu0 %122 }
 0x178   :  { %v128_v21 = vmul.f32 0.015625, %v123_v20 }
 0x17a   :  { %v130_v22 = vsub.f32 %v119_v16, %v128_v21 }
 0x17b   :  { %v126_v23 = vpop.xlane.xlu0 %125 }
 0x17c   :  { %v129_v24 = vmul.f32 0.015625, %v126_v23  ;;  %v132_v25 = vmul.f32 %v130_v22, %v130_v22 }
 0x17e   :  { %v131_v26 = vsub.f32 %v120_v18, %v129_v24  ;;  %v134_v27 = vsel %vm70_vm1, %v132_v25, 0.0 }
 0x17f   :  { %135 = vadd.xlane.f32.xlu1 %v134_v27 }
 0x180   :  { %v133_v28 = vmul.f32 %v131_v26, %v131_v26 }
 0x182   :  { %v137_v29 = vsel %vm70_vm1, %v133_v28, 0.0 }
 0x183   :  { %138 = vadd.xlane.f32.xlu1 %v137_v29 }
 0x20c   :  { %v136_v30 = vpop.xlane.xlu1 %135 }
 0x20d   :  { %v140_v31 = vmul.f32 0.015625, %v136_v30 }
 0x20f   :  { %v142_v32 = vadd.f32 1e-12, %v140_v31 }
 0x210   :  { %v139_v33 = vpop.xlane.xlu1 %138 }
 0x211   :  { %222 = vrsqrt.f32 %v142_v32  ;;  %v141_v34 = vmul.f32 0.015625, %v139_v33 }
 0x213   :  { %v143_v35 = vadd.f32 1e-12, %v141_v34 }
 0x215   :  { %224 = vrsqrt.f32 %v143_v35 }
 0x21b   :  { %v223_v36 = vpop.eup %222 }
 0x21c   :  { %v146_v38 = vmul.f32 %v223_v36, %v130_v22 }
 0x21e   :  { %v155_v40 = vmul.f32 %v188_v37, %v146_v38 }
 0x21f   :  { %v225_v41 = vpop.eup %224 }
 0x220   :  { %v164_v42 = vadd.f32 %v189_v39, %v155_v40  ;;  %v147_v43 = vmul.f32 %v225_v41, %v131_v26 }
 0x222   :  { %v192_v44 = vpack.c.bf16 %v164_v42, %v164_v42  ;;  %v156_v45 = vmul.f32 %v188_v37, %v147_v43 }
 0x224   :  { %175 = vst.msk [vmem:[%s307_s6] sm:$0xf] %vm174_vm2, %v192_v44  ;;  %v165_v46 = vadd.f32 %v189_v39, %v156_v45 }
 0x226   :  { %v193_v47 = vpack.c.bf16 %v165_v46, %v165_v46 }
 0x228   :  { %176 = vst.msk [vmem:[%s307_s6 + $0x4] sm:$0xf] %vm174_vm2, %v193_v47 }

// kernel: event_detection_forward.12
= control target key start
LH: loop header
LB: loop body
LE: loop exit
PB: predicated region body
PF: predicated region fallthrough
CT: control target
= control target key end

     0   :  { %s852_s9 = smov 0   ;;  %s953_s0 = inlined_call_operand.vmem [shape: bf16[16,192], index: 0, kind: input, shape index: {}]   ;;  %s954_s1 = inlined_call_operand.vmem [shape: f32[2,1,8], index: 1, kind: input, shape index: {}]   ;;  %s955_s2 = inlined_call_operand.vmem [shape: bf16[16,64], index: 2, kind: output, shape index: {}]  }
   0x1 LB: > { %s699_s10 = sadd.s32 4294967295, %s826_s9   ;;  %p703_p0 = scmp.ge.s32.totalorder %s826_s9, 1  ;;  %s826_s9 = sphi %s852_s9, %s12_s9  }
   0x2   : > { %p120_p1 = scmp.lt.s32.totalorder %s826_s9, 3 }
   0x4   : > { %p121_p2 = pnand %p703_p0, %p120_p1 }
   0x5   : > { %p144_p3 = scmp.lt.s32.totalorder (!%p121_p2), %s699_s10, 1  ;;  %v828_v0 = vmov (!%p121_p2), 0.0   ;;  %vm829_vm0 = vmmov (!%p121_p2), 0   ;;  %s830_s15 = smov (!%p121_p2), 64   ;;  %vm164_vm1 = vcmask (!%p121_p2), 130048   ;;  %vm219_vm2 = vcmask (!%p121_p2), 64512  }
   0x6   : > { %124 = sbr.rel (%p121_p2) target bundleno = 1561 (0x619), region = 28  ;;  %737 = vmatprep.subr.bf16.mxu0 (!%p121_p2), %v828_v0  ;;  %739 = vmatprep.mubr.msk.bf16.mxu0 (!%p121_p2), %vm829_vm0, %v828_v0  ;;  %s831_s16 = smov (!%p121_p2), 48   ;;  %vm237_vm3 = vcmask (!%p121_p2), 1043456   ;;  %vm630_vm4 = vcmask (!%p121_p2), 261120   ;;  %vm632_vm5 = vcmask (!%p121_p2), 392192   ;;  %vm635_vm6 = vcmask (!%p121_p2), 519168  }
   0x7   : > { %743 = vmatprep.subr.bf16.mxu1 (!%p121_p2), %v828_v0  ;;  %745 = vmatprep.mubr.msk.bf16.mxu1 (!%p121_p2), %vm829_vm0, %v828_v0  ;;  %s832_s20 = smov (!%p121_p2), 80   ;;  %s833_s21 = smov (!%p121_p2), 112  }
   0x8   : > { %s834_s22 = smov (!%p121_p2), 32   ;;  %s835_s23 = smov (!%p121_p2), 96  }
   0x9   : > { %s836_s24 = smov (!%p121_p2), 16  }
   0xd   : > { %s957_s10 = smov (!%p144_p3, %s699_s10), 1 }
   0xe   : > { %s720_s11 = sshll.u32 %s957_s10, 3  ;;  %s151_s19 = scalar_lea.vmem %s954_s1, %s957_s10 }
   0xf   : > { %s148_s14 = scalar_lea.vmem %s953_s0, %s720_s11  ;;  %v882_v6 = vld [vmem:[%s151_s19] ss:$0 sm:$0xff]  ;;  %s706_s25 = sshll.u32 %s957_s10, 2 }
  0x10   : > { %v157_v1 = vld [vmem:[%s148_s14] sm:$0xff]  ;;  %s155_s28 = scalar_lea.vmem %s955_s2, %s706_s25 }
  0x11   : > { %v707_v2 = vcombine.low %v157_v1, %v157_v1  ;;  %v888_v18 = vcombine.high %v157_v1, %v157_v1 }
  0x13   : > { %162 = vrot.lane.b32.xlu0 %v707_v2, %s830_s15  ;;  %283 = vrot.lane.b32.xlu1 %v707_v2, %s831_s16  ;;  %v239_v19 = vsel %vm237_vm3, %v888_v18, 0 }
  0x14   : > { %744 = vmatpush3.bf16.msra.mxu1 %v239_v19 }
  0x15   : > { %749 = vmatprep.subr.bf16.mxu1 %v828_v0 }
  0x85   : > { %v163_v3 = vpop.permute.xlu0 %162  ;;  %v284_v20 = vpop.permute.xlu1 %283 }
  0x86   : > { %v169_v4 = vsel %vm164_vm1, %v163_v3, 0  ;;  %v289_v27 = vsel %vm164_vm1, %v284_v20, 0 }
  0x87   : > { %738 = vmatpush3.bf16.xpose.msra.mxu0 %v169_v4 }
  0x88   : > { %755 = vmatprep.subr.bf16.mxu0 %v828_v0 }
  0x8e   : > { %740 = vmatmul.mubr.msk.bf16.vlgmr.msra.gmra.mrb[0].mxu0 %vm164_vm1, %v157_v1 }
  0x8f   : > { %757 = vmatprep.mubr.msk.bf16.mxu0 %vm829_vm0, %v828_v0 }
 0x161   : > { %v205_v5 = vpop.f32.mrb[0].mxu0 }
 0x162   : > { %v211_v7 = vmul.f32 0.25, %v205_v5  ;;  %v741_v8 = vpop.f32.mrb[1].mxu0 }
 0x163   : > { %v208_v9 = vpop.f32.mrb[2].mxu0 }
 0x164   : > { %v742_v10 = vpop.f32.mrb[3].mxu0  ;;  %v218_v11 = vadd.f32 %v882_v6, %v211_v7 }
 0x166   : > { %v220_v12 = vsel %vm219_vm2, %v218_v11, -inf }
 0x167   : > { %221 = vmax.xlane.f32.xlu0 %v220_v12 }
 0x17d   : > { %505 = vrot.lane.b32.xlu0 %v707_v2, %s832_s20 }
 0x1f4   : > { %v222_v13 = vpop.xlane.xlu0 %221 }
 0x1f5   : > { %v223_v14 = vsub.f32 %v218_v11, %v222_v13 }
 0x1f7   : > { %v224_v15 = vmul.f32 1.442695, %v223_v14 }
 0x1f8   : > { %v506_v32 = vpop.permute.xlu0 %505 }
 0x1f9   : > { %804 = vpow2.f32 %v224_v15 }
 0x203   : > { %v805_v16 = vpop.eup %804 }
 0x204   : > { %v226_v17 = vsel %vm219_vm2, %v805_v16, 0.0 }
 0x205   : > { %227 = vadd.xlane.f32.xlu1 %v226_v17 }
 0x216   : > { %281 = vrot.lane.b32.xlu1 %v707_v2, %s833_s21 }
 0x21a   : > { %395 = vrot.lane.b32.xlu1 %v707_v2, %s834_s22 }
 0x21e   : > { %393 = vrot.lane.b32.xlu1 %v707_v2, %s835_s23 }
 0x222   : > { %507 = vrot.lane.b32.xlu1 %v707_v2, %s836_s24 }
 0x292   : > { %v228_v21 = vpop.xlane.xlu1 %227 }
 0x293   : > { %806 = vrcp.f32 %v228_v21 }
 0x296   : > { %v282_v22 = vpop.permute.xlu1 %281 }
 0x29a   : > { %v396_v26 = vpop.permute.xlu1 %395 }
 0x29b   : > { %v401_v29 = vsel %vm164_vm1, %v396_v26, 0 }
 0x29d   : > { %v807_v23 = vpop.eup %806 }
 0x29e   : > { %v230_v24 = vmul.f32 %v807_v23, %v805_v16  ;;  %v394_v28 = vpop.permute.xlu1 %393 }
 0x2a0   : > { %v231_v25 = vpack.c.bf16 %v230_v24, %v230_v24 }
 0x2a2   : > { %746 = vmatmul.mubr.msk.bf16.vlgmr.msra.gmra.mrb[0].mxu1 %vm219_vm2, %v231_v25  ;;  %v508_v30 = vpop.permute.xlu1 %507 }
 0x2a3   : > { %750 = vmatpush3.bf16.xpose.msra.mxu1 %v289_v27  ;;  %751 = vmatprep.mubr.msk.bf16.mxu1 %vm829_vm0, %v828_v0  ;;  %v513_v31 = vsel %vm164_vm1, %v508_v30, 0 }
 0x2a4   : > { %761 = vmatprep.subr.bf16.mxu1 %v828_v0 }
 0x2aa   : > { %752 = vmatmul.mubr.msk.bf16.vlgmr.msra.gmra.mrb[4].mxu1 %vm164_vm1, %v282_v22 }
 0x2ab   : > { %762 = vmatpush3.bf16.xpose.msra.mxu1 %v401_v29  ;;  %763 = vmatprep.mubr.msk.bf16.mxu1 %vm829_vm0, %v828_v0 }
 0x2ac   : > { %773 = vmatprep.subr.bf16.mxu1 %v828_v0 }
 0x2b2   : > { %764 = vmatmul.mubr.msk.bf16.vlgmr.msra.gmra.mrb[8].mxu1 %vm164_vm1, %v394_v28 }
 0x2b3   : > { %774 = vmatpush3.bf16.xpose.msra.mxu1 %v513_v31  ;;  %775 = vmatprep.mubr.msk.bf16.mxu1 %vm829_vm0, %v828_v0 }
 0x2ba   : > { %776 = vmatmul.mubr.msk.bf16.vlgmr.msra.gmra.mrb[12].mxu1 %vm164_vm1, %v506_v32 }
 0x375   : > { %v912_v33 = vpop.f32.mrb[0].mxu1 }
 0x376   : > { %v747_v34 = vpop.f32.mrb[1].mxu1 }
 0x377   : > { %v278_v35 = vpop.f32.mrb[2].mxu1 }
 0x378   : > { %v748_v36 = vpop.f32.mrb[3].mxu1 }
 0x37d   : > { %v325_v37 = vpop.f32.mrb[4].mxu1 }
 0x37e   : > { %v331_v38 = vmul.f32 0.25, %v325_v37  ;;  %v753_v39 = vpop.f32.mrb[5].mxu1 }
 0x37f   : > { %v328_v40 = vpop.f32.mrb[6].mxu1 }
 0x380   : > { %v754_v41 = vpop.f32.mrb[7].mxu1  ;;  %v332_v42 = vadd.f32 %v882_v6, %v331_v38 }
 0x382   : > { %v333_v43 = vsel %vm219_vm2, %v332_v42, -inf }
 0x383   : > { %334 = vmax.xlane.f32.xlu1 %v333_v43 }
 0x385   : > { %v437_v44 = vpop.f32.mrb[8].mxu1 }
 0x386   : > { %v443_v45 = vmul.f32 0.25, %v437_v44  ;;  %v765_v46 = vpop.f32.mrb[9].mxu1 }
 0x387   : > { %v440_v47 = vpop.f32.mrb[10].mxu1 }
 0x388   : > { %v766_v48 = vpop.f32.mrb[11].mxu1  ;;  %v444_v49 = vadd.f32 %v882_v6, %v443_v45 }
 0x38a   : > { %v445_v50 = vsel %vm219_vm2, %v444_v49, -inf }
 0x38b   : > { %446 = vmax.xlane.f32.xlu0 %v445_v50 }
 0x38d   : > { %v549_v51 = vpop.f32.mrb[12].mxu1 }
 0x38e   : > { %v555_v52 = vmul.f32 0.25, %v549_v51  ;;  %v777_v53 = vpop.f32.mrb[13].mxu1 }
 0x38f   : > { %v552_v54 = vpop.f32.mrb[14].mxu1 }
 0x390   : > { %v778_v55 = vpop.f32.mrb[15].mxu1  ;;  %v556_v56 = vadd.f32 %v882_v6, %v555_v52 }
 0x392   : > { %v557_v57 = vsel %vm219_vm2, %v556_v56, -inf }
 0x393   : > { %558 = vmax.xlane.f32.xlu1 %v557_v57 }
 0x3a1   : > { %345 = vrot.lane.b32.xlu0 %v888_v18, %s833_s21 }
 0x3a4   : > { %457 = vrot.lane.b32.xlu1 %v888_v18, %s835_s23 }
 0x410   : > { %v335_v58 = vpop.xlane.xlu1 %334 }
 0x411   : > { %v336_v59 = vsub.f32 %v332_v42, %v335_v58 }
 0x413   : > { %v337_v60 = vmul.f32 1.442695, %v336_v59 }
 0x415   : > { %808 = vpow2.f32 %v337_v60 }
 0x418   : > { %v447_v61 = vpop.xlane.xlu0 %446 }
 0x419   : > { %v448_v62 = vsub.f32 %v444_v49, %v447_v61 }
 0x41b   : > { %v449_v63 = vmul.f32 1.442695, %v448_v62 }
 0x41c   : > { %v346_v10 = vpop.permute.xlu0 %345 }
 0x41d   : > { %810 = vpow2.f32 %v449_v63  ;;  %v351_v11 = vsel %vm237_vm3, %v346_v10, 0 }
 0x41e   : > { %756 = vmatpush3.bf16.msra.mxu0 %v351_v11 }
 0x41f   : > { %v809_v1 = vpop.eup %808  ;;  %767 = vmatprep.subr.bf16.mxu0 %v828_v0 }
 0x420   : > { %v559_v2 = vpop.xlane.xlu1 %558  ;;  %v339_v3 = vsel %vm219_vm2, %v809_v1, 0.0 }
 0x421   : > { %v560_v4 = vsub.f32 %v556_v56, %v559_v2  ;;  %340 = vadd.xlane.f32.xlu1 %v339_v3 }
 0x423   : > { %v561_v5 = vmul.f32 1.442695, %v560_v4 }
 0x424   : > { %v458_v12 = vpop.permute.xlu1 %457 }
 0x425   : > { %812 = vpow2.f32 %v561_v5  ;;  %v463_v19 = vsel %vm237_vm3, %v458_v12, 0 }
 0x427   : > { %v811_v6 = vpop.eup %810 }
 0x428   : > { %v451_v7 = vsel %vm219_vm2, %v811_v6, 0.0 }
 0x429   : > { %452 = vadd.xlane.f32.xlu1 %v451_v7 }
 0x42f   : > { %v813_v8 = vpop.eup %812 }
 0x430   : > { %v563_v9 = vsel %vm219_vm2, %v813_v8, 0.0 }
 0x431   : > { %564 = vadd.xlane.f32.xlu1 %v563_v9 }
 0x442   : > { %569 = vrot.lane.b32.xlu1 %v888_v18, %s832_s20 }
 0x4ae   : > { %v341_v13 = vpop.xlane.xlu1 %340 }
 0x4af   : > { %814 = vrcp.f32 %v341_v13 }
 0x4b6   : > { %v453_v14 = vpop.xlane.xlu1 %452 }
 0x4b7   : > { %816 = vrcp.f32 %v453_v14 }
 0x4b9   : > { %v815_v15 = vpop.eup %814 }
 0x4ba   : > { %v343_v16 = vmul.f32 %v815_v15, %v809_v1 }
 0x4bc   : > { %v344_v17 = vpack.c.bf16 %v343_v16, %v343_v16 }
 0x4be   : > { %v565_v20 = vpop.xlane.xlu1 %564  ;;  %758 = vmatmul.mubr.msk.bf16.vlgmr.msra.gmra.mrb[4].mxu0 %vm219_vm2, %v344_v17 }
 0x4bf   : > { %818 = vrcp.f32 %v565_v20  ;;  %768 = vmatpush3.bf16.msra.mxu0 %v463_v19  ;;  %769 = vmatprep.mubr.msk.bf16.mxu0 %vm829_vm0, %v828_v0 }
 0x4c0   : > { %779 = vmatprep.subr.bf16.mxu0 %v828_v0 }
 0x4c1   : > { %v817_v18 = vpop.eup %816 }
 0x4c2   : > { %v455_v21 = vmul.f32 %v817_v18, %v811_v6  ;;  %v570_v22 = vpop.permute.xlu1 %569 }
 0x4c3   : > { %v575_v23 = vsel %vm237_vm3, %v570_v22, 0 }
 0x4c4   : > { %v456_v24 = vpack.c.bf16 %v455_v21, %v455_v21 }
 0x4c6   : > { %770 = vmatmul.mubr.msk.bf16.vlgmr.msra.gmra.mrb[8].mxu0 %vm219_vm2, %v456_v24 }
 0x4c7   : > { %780 = vmatpush3.bf16.msra.mxu0 %v575_v23  ;;  %781 = vmatprep.mubr.msk.bf16.mxu0 %vm829_vm0, %v828_v0 }
 0x4c9   : > { %v819_v25 = vpop.eup %818 }
 0x4ca   : > { %v567_v26 = vmul.f32 %v819_v25, %v813_v8 }
 0x4cc   : > { %v568_v27 = vpack.c.bf16 %v567_v26, %v567_v26 }
 0x4ce   : > { %782 = vmatmul.mubr.msk.bf16.vlgmr.msra.gmra.mrb[12].mxu0 %vm219_vm2, %v568_v27 }
 0x591   : > { %v387_v28 = vpop.f32.mrb[4].mxu0 }
 0x592   : > { %618 = vrot.lane.b32.xlu0 %v387_v28, %s836_s24  ;;  %v759_v29 = vpop.f32.mrb[5].mxu0 }
 0x593   : > { %v390_v30 = vpop.f32.mrb[6].mxu0 }
 0x594   : > { %v760_v31 = vpop.f32.mrb[7].mxu0 }
 0x599   : > { %v499_v32 = vpop.f32.mrb[8].mxu0 }
 0x59a   : > { %622 = vrot.lane.b32.xlu1 %v499_v32, %s834_s22  ;;  %v771_v34 = vpop.f32.mrb[9].mxu0 }
 0x59b   : > { %v502_v35 = vpop.f32.mrb[10].mxu0 }
 0x59c   : > { %v772_v36 = vpop.f32.mrb[11].mxu0 }
 0x5a1   : > { %v611_v37 = vpop.f32.mrb[12].mxu0 }
 0x5a2   : > { %626 = vrot.lane.b32.xlu0 %v611_v37, %s831_s16  ;;  %v783_v0 = vpop.f32.mrb[13].mxu0 }
 0x5a3   : > { %v614_v38 = vpop.f32.mrb[14].mxu0 }
 0x5a4   : > { %v784_v39 = vpop.f32.mrb[15].mxu0 }
 0x604   : > { %v619_v40 = vpop.permute.xlu0 %618 }
 0x605   : > { %v629_v42 = vsel %vm164_vm1, %v912_v33, %v619_v40 }
 0x60c   : > { %v623_v41 = vpop.permute.xlu1 %622 }
 0x60d   : > { %v631_v43 = vsel %vm630_vm4, %v629_v42, %v623_v41 }
 0x614   : > { %v627_v44 = vpop.permute.xlu0 %626 }
 0x615   : > { %v633_v45 = vsel %vm632_vm5, %v631_v43, %v627_v44 }
 0x616   : > { %v634_v46 = vpack.c.bf16 %v633_v45, %v633_v45 }
 0x618   : > { %636 = vst.msk [vmem:[%s155_s28] sm:$0xf] %vm635_vm6, %v634_v46 }
 0x619 PF: > { %s12_s9 = sadd.s32 1, %s826_s9  }
 0x61a   : > { %p9_p4 = scmp.ge.s32.totalorder %s12_s9, 4  }
 0x61c   :  { %11 = sbr.rel (!%p9_p4) target bundleno = 1 (0x1), region = 61 }

// kernel: event_detection_forward.19
= control target key start
LH: loop header
LB: loop body
LE: loop exit
PB: predicated region body
PF: predicated region fallthrough
CT: control target
= control target key end

     0   :  { %v264_v0 = vmov 0.0   ;;  %vm265_vm0 = vmmov 0   ;;  %vm61_vm1 = vcmask 523264   ;;  %vm195_vm2 = vcmask 58368   ;;  %s334_s1 = inlined_call_operand.vmem [shape: bf16[64,64], index: 1, kind: input, shape index: {}]   ;;  %s335_s0 = inlined_call_operand.vmem [shape: bf16[2,64], index: 0, kind: input, shape index: {}]   ;;  %s336_s3 = inlined_call_operand.vmem [shape: bf16[64,8], index: 3, kind: input, shape index: {}]   ;;  %s337_s2 = inlined_call_operand.vmem [shape: f32[1,64], index: 2, kind: input, shape index: {}]   ;;  %s338_s4 = inlined_call_operand.vmem [shape: f32[1,8], index: 4, kind: input, shape index: {}]   ;;  %s339_s5 = inlined_call_operand.vmem [shape: f32[2,8], index: 5, kind: output, shape index: {}]  }
   0x1   :  { %224 = vmatprep.subr.bf16.mxu0 %v264_v0  ;;  %v250_v1 = vld [vmem:[%s334_s1] sm:$0xff]   ;;  %232 = vmatprep.mubr.msk.bf16.mxu0 %vm265_vm0, %v264_v0  ;;  %v251_v2 = vld [vmem:[%s334_s1 + $0x8] sm:$0xff]   ;;  %v252_v3 = vld [vmem:[%s334_s1 + $0x10] sm:$0xff]  }
   0x2   :  { %236 = vmatprep.subr.bf16.mxu1 %v264_v0  ;;  %244 = vmatprep.mubr.msk.bf16.mxu1 %vm265_vm0, %v264_v0  ;;  %v253_v4 = vld [vmem:[%s334_s1 + $0x18] sm:$0xff]   ;;  %v21_v5 = vld [vmem:[%s335_s0] sm:$0x1]  ;;  %v255_v7 = vld [vmem:[%s336_s3 + $0x8] sm:$0xff]  }
   0x3   :  { %225 = vmatpush3.bf16.msra.mxu0 %v250_v1  ;;  %v254_v6 = vld [vmem:[%s336_s3] sm:$0xff]   ;;  %v256_v8 = vld [vmem:[%s336_s3 + $0x10] sm:$0xff]   ;;  %v257_v9 = vld [vmem:[%s336_s3 + $0x18] sm:$0xff]  }
   0x4   :  { %226 = vmatprep.subr.bf16.mxu0 %v264_v0  ;;  %237 = vmatpush3.bf16.msra.mxu1 %v254_v6  ;;  %v201_v10 = vld [vmem:[%s337_s2] ss:$0 sm:$0xff] }
   0x5   :  { %238 = vmatprep.subr.bf16.mxu1 %v264_v0  ;;  %v207_v18 = vld [vmem:[%s338_s4] ss:$0 sm:$0xff] }
   0x7   :  { %227 = vmatpush3.bf16.msra.mxu0 %v251_v2 }
   0x8   :  { %228 = vmatprep.subr.bf16.mxu0 %v264_v0  ;;  %239 = vmatpush3.bf16.msra.mxu1 %v255_v7 }
   0x9   :  { %240 = vmatprep.subr.bf16.mxu1 %v264_v0 }
   0xb   :  { %229 = vmatpush3.bf16.msra.mxu0 %v252_v3 }
   0xc   :  { %230 = vmatprep.subr.bf16.mxu0 %v264_v0  ;;  %241 = vmatpush3.bf16.msra.mxu1 %v256_v8 }
   0xd   :  { %242 = vmatprep.subr.bf16.mxu1 %v264_v0 }
   0xf   :  { %231 = vmatpush3.bf16.msra.mxu0 %v253_v4 }
  0x10   :  { %243 = vmatpush3.bf16.msra.mxu1 %v257_v9 }
  0x12   :  { %233 = vmatmul.mubr.msk.bf16.vlgmr.msra.gmra.mrb[0].mxu0 %vm61_vm1, %v21_v5 }
  0xe5   :  { %v99_v11 = vpop.f32.mrb[0].mxu0 }
  0xe6   :  { %v100_v12 = vadd.f32 %v201_v10, %v99_v11  ;;  %v234_v13 = vpop.f32.mrb[1].mxu0 }
  0xe7   :  { %v102_v14 = vpop.f32.mrb[2].mxu0 }
  0xe8   :  { %258 = vtanh.f32 %v100_v12  ;;  %v235_v15 = vpop.f32.mrb[3].mxu0 }
  0xf2   :  { %v259_v16 = vpop.eup %258 }
  0xf3   :  { %v106_v17 = vpack.c.bf16 %v259_v16, %v259_v16 }
  0xf5   :  { %245 = vmatmul.mubr.msk.bf16.vlgmr.msra.gmra.mrb[0].mxu1 %vm61_vm1, %v106_v17 }
 0x1c8   :  { %v183_v19 = vpop.f32.mrb[0].mxu1 }
 0x1c9   :  { %v184_v20 = vadd.f32 %v207_v18, %v183_v19  ;;  %v246_v21 = vpop.f32.mrb[1].mxu1 }
 0x1ca   :  { %v186_v22 = vpop.f32.mrb[2].mxu1 }
 0x1cb   :  { %v213_v23 = vmul.f32 -1.442695, %v184_v20  ;;  %v247_v24 = vpop.f32.mrb[3].mxu1 }
 0x1cd   :  { %260 = vpow2.f32 %v213_v23 }
 0x1d7   :  { %v261_v25 = vpop.eup %260 }
 0x1d8   :  { %v192_v26 = vadd.f32 1.0, %v261_v25 }
 0x1da   :  { %262 = vrcp.f32 %v192_v26 }
 0x1e4   :  { %v263_v27 = vpop.eup %262 }
 0x1e5   :  { %196 = vst.msk [vmem:[%s339_s5] sm:$0x3] %vm195_vm2, %v263_v27 }

// kernel: event_detection_forward.14
= control target key start
LH: loop header
LB: loop body
LE: loop exit
PB: predicated region body
PF: predicated region fallthrough
CT: control target
= control target key end

     0   :  { %s1556_s24 = smov 0   ;;  %s1558_s25 = smov 0   ;;  %s1790_s0 = inlined_call_operand.vmem [shape: bf16[16,64], index: 0, kind: input, shape index: {}]   ;;  %s1791_s1 = inlined_call_operand.vmem [shape: bf16[64,1024], index: 1, kind: input, shape index: {}]   ;;  %s1792_s2 = inlined_call_operand.vmem [shape: f32[1,1024], index: 2, kind: input, shape index: {}]   ;;  %s1793_s3 = inlined_call_operand.vmem [shape: bf16[1024,64], index: 3, kind: input, shape index: {}]   ;;  %s1794_s4 = inlined_call_operand.vmem [shape: f32[1,64], index: 4, kind: input, shape index: {}]   ;;  %s1795_s5 = inlined_call_operand.vmem [shape: f32[1,64], index: 5, kind: input, shape index: {}]   ;;  %s1796_s6 = inlined_call_operand.vmem [shape: f32[1,64], index: 6, kind: input, shape index: {}]   ;;  %s1797_s7 = inlined_call_operand.vmem [shape: bf16[16,64], index: 7, kind: output, shape index: {}]  }
   0x1   :  { %s1560_s26 = smov 0   ;;  %s1562_s27 = smov 0  }
   0x2   :  { %s1564_s28 = smov 0  }
   0x3 LB: > { %s26_s29 = sadd.s32 1, %s1508_s27  ;;  %p69_p1 = scmp.ne.s32.totalorder %s1500_s25, %s1496_s24  ;;  %s1512_s28 = sphi %s1564_s28, %s17_s28   ;;  %s1508_s27 = sphi %s1562_s27, %s1801_s27   ;;  %s1504_s26 = sphi %s1560_s26, %s1800_s26   ;;  %s1500_s25 = sphi %s1558_s25, %s1799_s25   ;;  %s1496_s24 = sphi %s1556_s24, %s1798_s24  }
   0x4   : > { %p27_p0 = scmp.ge.s32.totalorder %s26_s29, 2  ;;  %p70_p2 = scmp.eq.s32.totalorder %s1512_s28, 0 }
   0x5   : > { %s62_s8 = sadd.s32 1, %s1500_s25  ;;  %p1233_p5 = scmp.ge.s32.totalorder %s1512_s28, 2 }
   0x6   : > { %s1803_s29 = smov (%p27_p0, %s26_s29), 0  ;;  %p71_p3 = por %p70_p2, %p69_p1 }
   0x7   : > { %s59_s30 = ssub.s32 %s1508_s27, %s1803_s29  ;;  %254 = sbr.rel (%p1233_p5) target bundleno = 26 (0x1a), region = 32 }
   0x8   : > { %p60_p4 = scmp.eq.s32.totalorder %s59_s30, 0 }
   0xa   : > { %s1591_s9 = scalar_select %p60_p4, %s1500_s25, %s62_s8  }
   0xe   : > { %257 = sbr.rel (!%p71_p3) target bundleno = 26 (0x1a), region = 36  ;;  %s259_s10 = sand.u32 (%p71_p3), 1, %s1500_s25  }
   0xf   : > { %s1304_s11 = sshll.u32 (%p71_p3), %s1508_s27, 4  ;;  %s1234_s12 = sshll.u32 (%p71_p3), %s259_s10, 7 }
  0x10   : > { %s1599_s15 = scalar_lea.vmem (%p71_p3), %s1791_s1, %s1304_s11  ;;  %s261_s16 = scalar_lea.vmem (%p71_p3), [#allocation3], %s1234_s12 }
  0x11   : > { %v277_v0 = vld [vmem:[%s1599_s15] sm:$0xff] (%p71_p3)  ;;  %v279_v1 = vld [vmem:[%s1599_s15 + $0x8] sm:$0xff] (%p71_p3) }
  0x12   : > { %v281_v2 = vld [vmem:[%s1599_s15 + $0x20] sm:$0xff] (%p71_p3)  ;;  %278 = vst [vmem:[%s261_s16] sm:$0xff] (%p71_p3), %v277_v0  ;;  %280 = vst [vmem:[%s261_s16 + $0x8] sm:$0xff] (%p71_p3), %v279_v1  ;;  %v283_v3 = vld [vmem:[%s1599_s15 + $0x28] sm:$0xff] (%p71_p3) }
  0x13   : > { %282 = vst [vmem:[%s261_s16 + $0x10] sm:$0xff] (%p71_p3), %v281_v2  ;;  %v285_v4 = vld [vmem:[%s1599_s15 + $0x40] sm:$0xff] (%p71_p3)  ;;  %v287_v5 = vld [vmem:[%s1599_s15 + $0x48] sm:$0xff] (%p71_p3)  ;;  %284 = vst [vmem:[%s261_s16 + $0x18] sm:$0xff] (%p71_p3), %v283_v3 }
  0x14   : > { %286 = vst [vmem:[%s261_s16 + $0x20] sm:$0xff] (%p71_p3), %v285_v4  ;;  %288 = vst [vmem:[%s261_s16 + $0x28] sm:$0xff] (%p71_p3), %v287_v5  ;;  %v289_v6 = vld [vmem:[%s1599_s15 + $0x60] sm:$0xff] (%p71_p3)  ;;  %v291_v7 = vld [vmem:[%s1599_s15 + $0x68] sm:$0xff] (%p71_p3) }
  0x15   : > { %v293_v8 = vld [vmem:[%s1599_s15 + $0x80] sm:$0xff]  ;;  %290 = vst [vmem:[%s261_s16 + $0x30] sm:$0xff] %v289_v6  ;;  %292 = vst [vmem:[%s261_s16 + $0x38] sm:$0xff] %v291_v7  ;;  %v295_v9 = vld [vmem:[%s1599_s15 + $0x88] sm:$0xff] }
  0x16   : > { %294 = vst [vmem:[%s261_s16 + $0x40] sm:$0xff] %v293_v8  ;;  %v297_v10 = vld [vmem:[%s1599_s15 + $0xa0] sm:$0xff]  ;;  %v299_v11 = vld [vmem:[%s1599_s15 + $0xa8] sm:$0xff]  ;;  %296 = vst [vmem:[%s261_s16 + $0x48] sm:$0xff] %v295_v9 }
  0x17   : > { %298 = vst [vmem:[%s261_s16 + $0x50] sm:$0xff] %v297_v10  ;;  %300 = vst [vmem:[%s261_s16 + $0x58] sm:$0xff] %v299_v11  ;;  %v301_v12 = vld [vmem:[%s1599_s15 + $0xc0] sm:$0xff]  ;;  %v303_v13 = vld [vmem:[%s1599_s15 + $0xc8] sm:$0xff] }
  0x18   : > { %v305_v14 = vld [vmem:[%s1599_s15 + $0xe0] sm:$0xff]  ;;  %302 = vst [vmem:[%s261_s16 + $0x60] sm:$0xff] %v301_v12  ;;  %304 = vst [vmem:[%s261_s16 + $0x68] sm:$0xff] %v303_v13  ;;  %v307_v15 = vld [vmem:[%s1599_s15 + $0xe8] sm:$0xff] }
  0x19   : > { %306 = vst [vmem:[%s261_s16 + $0x70] sm:$0xff] %v305_v14  ;;  %308 = vst [vmem:[%s261_s16 + $0x78] sm:$0xff] %v307_v15 }
  0x1a PF: > { %p1237_p6 = scmp.ge.s32.totalorder %s1512_s28, 1  ;;  %p330_p7 = scmp.lt.s32.totalorder %s1512_s28, 3 }
  0x1c   : > { %p331_p8 = pnand %p1237_p6, %p330_p7 }
  0x1d   : > { %s337_s17 = sand.u32 (!%p331_p8), 1, %s1496_s24   ;;  %s1239_s18 = sshll.u32 (!%p331_p8), %s1504_s26, 2 }
  0x1e   : > { %334 = sbr.rel (%p331_p8) target bundleno = 866 (0x362), region = 67  ;;  %s1238_s19 = sshll.u32 (!%p331_p8), %s337_s17, 7 }
  0x1f   : > { %p390_p9 = scmp.lt.s32.totalorder (!%p331_p8), %s1239_s18, 7  ;;  %s1240_s20 = sshll.u32 (!%p331_p8), %s1504_s26, 6 }
  0x20   : > { %p395_p10 = scmp.lt.s32.totalorder (!%p331_p8), %s1240_s20, 127  ;;  %s1633_s24 = scalar_lea.vmem (!%p331_p8), [#allocation3], %s1238_s19 }
  0x21   : > { %p1242_p11 = scmp.ne.s32.totalorder (!%p331_p8), %s1504_s26, 0 }
  0x25   : > { %s1805_s18 = smov (!%p390_p9, %s1239_s18), 7  ;;  %s1807_s20 = smov (!%p395_p10, %s1240_s20), 127 }
  0x26   : > { %s392_s23 = scalar_lea.vmem %s1792_s2, %s1805_s18  ;;  %s1241_s30 = sshll.u32 %s1807_s20, 2  ;;  %vm411_vm0 = vcmask (!%p1242_p11), 523264   ;;  %v1514_v16 = vmov (!%p1242_p11), 0.0  }
  0x27   : > { %s1631_s11 = scalar_lea.vmem %s1793_s3, %s1241_s30  ;;  %410 = sbr.rel (%p1242_p11) target bundleno = 46 (0x2e), region = 75  ;;  %412 = vst.msk [vmem:[#allocation2] sm:$0xff] (!%p1242_p11), %vm411_vm0, %v1514_v16  ;;  %413 = vst.msk [vmem:[#allocation2 + $0x8] sm:$0xff] (!%p1242_p11), %vm411_vm0, %v1514_v16 }
  0x2e PF: > { %v1397_v17 = vld [vmem:[%s1633_s24 + $0x4] ss:$16 sps:$4 sm:$0xff]   ;;  %v1399_v18 = vld [vmem:[%s1633_s24 + $0xc] ss:$16 sps:$4 sm:$0xff]   ;;  %v1515_v19 = vmov 0   ;;  %vm539_vm1 = vcmask 523264   ;;  %v434_v3 = vlaneseq }
  0x2f   : > { %575 = vmatprep.mubr.bf16.mxu0 %v1515_v19  ;;  %618 = vmatprep.mubr.bf16.mxu1 %v1515_v19  ;;  %v1401_v20 = vld [vmem:[%s1633_s24] ss:$16 sps:$4 sm:$0xff]   ;;  %v1402_v21 = vld [vmem:[%s1633_s24 + $0x8] ss:$16 sps:$4 sm:$0xff]   ;;  %v1403_v22 = vld [vmem:[%s1633_s24 + $0x24] ss:$16 sps:$4 sm:$0xff]  }
  0x30   : > { %543 = vmatprep.subr.bf16.mxu0 %v1397_v17  ;;  %586 = vmatprep.subr.bf16.mxu1 %v1399_v18  ;;  %v1405_v23 = vld [vmem:[%s1633_s24 + $0x2c] ss:$16 sps:$4 sm:$0xff]   ;;  %v1407_v24 = vld [vmem:[%s1633_s24 + $0x20] ss:$16 sps:$4 sm:$0xff]   ;;  %v1408_v25 = vld [vmem:[%s1633_s24 + $0x28] ss:$16 sps:$4 sm:$0xff]  }
  0x31   : > { %544 = vmatpush1.bf16.msra.mxu0 %v1401_v20  ;;  %587 = vmatpush1.bf16.msra.mxu1 %v1402_v21  ;;  %v1409_v26 = vld [vmem:[%s1633_s24 + $0x44] ss:$16 sps:$4 sm:$0xff]   ;;  %v1411_v27 = vld [vmem:[%s1633_s24 + $0x4c] ss:$16 sps:$4 sm:$0xff]   ;;  %v1413_v28 = vld [vmem:[%s1633_s24 + $0x40] ss:$16 sps:$4 sm:$0xff]  }
  0x32   : > { %545 = vmatprep.subr.bf16.mxu0 %v1403_v22  ;;  %588 = vmatprep.subr.bf16.mxu1 %v1405_v23  ;;  %v1414_v29 = vld [vmem:[%s1633_s24 + $0x48] ss:$16 sps:$4 sm:$0xff]   ;;  %v1415_v30 = vld [vmem:[%s1633_s24 + $0x64] ss:$16 sps:$4 sm:$0xff]   ;;  %v1417_v31 = vld [vmem:[%s1633_s24 + $0x6c] ss:$16 sps:$4 sm:$0xff]  }
  0x33   : > { %v1419_v32 = vld [vmem:[%s1633_s24 + $0x60] ss:$16 sps:$4 sm:$0xff]   ;;  %v1420_v33 = vld [vmem:[%s1633_s24 + $0x68] ss:$16 sps:$4 sm:$0xff]   ;;  %v435_v4 = vshrl.u32 %v434_v3, 7  ;;  %p1294_p12 = scmp.ne.s32.totalorder %s1504_s26, 1 }
  0x34   : > { %v1421_v34 = vld [vmem:[%s1790_s0] sm:$0xff]   ;;  %v1426_v39 = vld [vmem:[%s1631_s11 + $0x48] sm:$0xff]   ;;  %v1430_v43 = vld [vmem:[%s1631_s11 + $0x50] sm:$0xff]   ;;  %vm1123_vm2 = vcmask (!%p1294_p12), 519168  }
  0x35   : > { %546 = vmatpush1.bf16.msra.mxu0 %v1407_v24  ;;  %589 = vmatpush1.bf16.msra.mxu1 %v1408_v25  ;;  %v1422_v35 = vld [vmem:[%s1631_s11 + $0x40] sm:$0xff]   ;;  %v1427_v40 = vld [vmem:[%s1631_s11 + $0xc8] sm:$0xff]   ;;  %v1431_v44 = vld [vmem:[%s1631_s11 + $0xd0] sm:$0xff]   ;;  %v436_v5 = vsub.s32 0, %v435_v4  ;;  %v444_v6 = vsub.s32 2, %v435_v4  ;;  %v440_v8 = vsub.s32 1, %v435_v4 }
  0x36   : > { %547 = vmatprep.subr.bf16.mxu0 %v1409_v26  ;;  %590 = vmatprep.subr.bf16.mxu1 %v1411_v27  ;;  %v1423_v36 = vld [vmem:[%s1631_s11 + $0xc0] sm:$0xff]   ;;  %v1428_v41 = vld [vmem:[%s1631_s11 + $0x8] sm:$0xff]   ;;  %v1432_v45 = vld [vmem:[%s1631_s11 + $0x10] sm:$0xff]   ;;  %v448_v9 = vsub.s32 3, %v435_v4 }
  0x37   : > { %v1424_v37 = vld [vmem:[%s1631_s11] sm:$0xff]   ;;  %v1429_v42 = vld [vmem:[%s1631_s11 + $0x88] sm:$0xff]   ;;  %v1433_v46 = vld [vmem:[%s1631_s11 + $0x90] sm:$0xff]  }
  0x38   : > { %v1425_v38 = vld [vmem:[%s1631_s11 + $0x80] sm:$0xff]   ;;  %v1434_v47 = vld [vmem:[%s1631_s11 + $0x58] sm:$0xff]   ;;  %v1442_v55 = vld [vmem:[%s1631_s11 + $0x68] sm:$0xff]  }
  0x39   : > { %548 = vmatpush1.bf16.msra.mxu0 %v1413_v28  ;;  %591 = vmatpush1.bf16.msra.mxu1 %v1414_v29  ;;  %v1435_v48 = vld [vmem:[%s1631_s11 + $0xd8] sm:$0xff]   ;;  %v1438_v51 = vld [vmem:[%s1631_s11 + $0x60] sm:$0xff]   ;;  %v1443_v56 = vld [vmem:[%s1631_s11 + $0xe8] sm:$0xff]  }
  0x3a   : > { %549 = vmatprep.subr.bf16.mxu0 %v1415_v30  ;;  %592 = vmatprep.subr.bf16.mxu1 %v1417_v31  ;;  %v1436_v49 = vld [vmem:[%s1631_s11 + $0x18] sm:$0xff]   ;;  %v1439_v52 = vld [vmem:[%s1631_s11 + $0xe0] sm:$0xff]   ;;  %v1444_v57 = vld [vmem:[%s1631_s11 + $0x28] sm:$0xff]  }
  0x3b   : > { %v1437_v50 = vld [vmem:[%s1631_s11 + $0x98] sm:$0xff]   ;;  %v1440_v53 = vld [vmem:[%s1631_s11 + $0x20] sm:$0xff]   ;;  %v1445_v58 = vld [vmem:[%s1631_s11 + $0xa8] sm:$0xff]  }
  0x3c   : > { %v1441_v54 = vld [vmem:[%s1631_s11 + $0xa0] sm:$0xff]   ;;  %v1446_v59 = vld [vmem:[%s1631_s11 + $0x70] sm:$0xff]   ;;  %v1450_v63 = vld [vmem:[%s1631_s11 + $0x78] sm:$0xff]  }
  0x3d   : > { %550 = vmatpush1.bf16.msra.mxu0 %v1419_v32  ;;  %593 = vmatpush1.bf16.msra.mxu1 %v1420_v33  ;;  %v1447_v60 = vld [vmem:[%s1631_s11 + $0xf0] sm:$0xff]   ;;  %v1451_v0 = vld [vmem:[%s1631_s11 + $0xf8] sm:$0xff]   ;;  %v432_v7 = vld [vmem:[%s392_s23] sm:$0xf] }
  0x3e   : > { %1311 = vmatprep.subr.bf16.mxu0 %v1422_v35  ;;  %1333 = vmatprep.subr.bf16.mxu1 %v1423_v36  ;;  %v1448_v61 = vld [vmem:[%s1631_s11 + $0x30] sm:$0xff]   ;;  %v1452_v1 = vld [vmem:[%s1631_s11 + $0x38] sm:$0xff]   ;;  %v437_v10 = vrot.slane %v432_v7, %v436_v5  ;;  %v445_v11 = vrot.slane %v432_v7, %v444_v6  ;;  %v441_v12 = vrot.slane %v432_v7, %v440_v8 }
  0x3f   : > { %v1449_v62 = vld [vmem:[%s1631_s11 + $0xb0] sm:$0xff]   ;;  %v1453_v2 = vld [vmem:[%s1631_s11 + $0xb8] sm:$0xff]   ;;  %v449_v13 = vrot.slane %v432_v7, %v448_v9 }
  0x40   : > { %1260 = vmatmul.mubr.msk.bf16.vlgmr.msra.gmra.mrb[0].mxu0 %vm539_vm1, %v1421_v34  ;;  %1261 = vmatmul.mubr.msk.bf16.vlgmr.msra.gmra.mrb[0].mxu1 %vm539_vm1, %v1421_v34 }
  0x41   : > { %1312 = vmatpush3.bf16.msra.mxu0 %v1424_v37  ;;  %1334 = vmatpush3.bf16.msra.mxu1 %v1425_v38 }
  0x42   : > { %1313 = vmatprep.subr.bf16.mxu0 %v1426_v39  ;;  %1335 = vmatprep.subr.bf16.mxu1 %v1427_v40 }
  0x45   : > { %1314 = vmatpush3.bf16.msra.mxu0 %v1428_v41  ;;  %1336 = vmatpush3.bf16.msra.mxu1 %v1429_v42 }
  0x46   : > { %1315 = vmatprep.subr.bf16.mxu0 %v1430_v43  ;;  %1337 = vmatprep.subr.bf16.mxu1 %v1431_v44 }
  0x49   : > { %1316 = vmatpush3.bf16.msra.mxu0 %v1432_v45  ;;  %1338 = vmatpush3.bf16.msra.mxu1 %v1433_v46 }
  0x4a   : > { %1317 = vmatprep.subr.bf16.mxu0 %v1434_v47  ;;  %1339 = vmatprep.subr.bf16.mxu1 %v1435_v48 }
  0x4d   : > { %1318 = vmatpush3.bf16.msra.mxu0 %v1436_v49  ;;  %1340 = vmatpush3.bf16.msra.mxu1 %v1437_v50 }
  0x4e   : > { %1319 = vmatprep.subr.bf16.mxu0 %v1438_v51  ;;  %1341 = vmatprep.subr.bf16.mxu1 %v1439_v52 }
  0x51   : > { %1320 = vmatpush3.bf16.msra.mxu0 %v1440_v53  ;;  %1342 = vmatpush3.bf16.msra.mxu1 %v1441_v54 }
  0x52   : > { %1321 = vmatprep.subr.bf16.mxu0 %v1442_v55  ;;  %1343 = vmatprep.subr.bf16.mxu1 %v1443_v56 }
  0x55   : > { %1322 = vmatpush3.bf16.msra.mxu0 %v1444_v57  ;;  %1344 = vmatpush3.bf16.msra.mxu1 %v1445_v58 }
  0x56   : > { %1323 = vmatprep.subr.bf16.mxu0 %v1446_v59  ;;  %1345 = vmatprep.subr.bf16.mxu1 %v1447_v60 }
  0x59   : > { %1324 = vmatpush3.bf16.msra.mxu0 %v1448_v61  ;;  %1346 = vmatpush3.bf16.msra.mxu1 %v1449_v62 }
  0x5a   : > { %1325 = vmatprep.subr.bf16.mxu0 %v1450_v63  ;;  %1347 = vmatprep.subr.bf16.mxu1 %v1451_v0 }
  0x5d   : > { %1326 = vmatpush3.bf16.msra.mxu0 %v1452_v1  ;;  %1348 = vmatpush3.bf16.msra.mxu1 %v1453_v2 }
 0x113   : > { %v577_v14 = vpop.f32.mrb[0].mxu0  ;;  %v620_v15 = vpop.f32.mrb[0].mxu1 }
 0x114   : > { %v1694_v16 = vadd.f32 %v577_v14, %v437_v10  ;;  %v1696_v17 = vadd.f32 %v620_v15, %v445_v11  ;;  %v579_v18 = vpop.f32.mrb[1].mxu0  ;;  %v622_v19 = vpop.f32.mrb[1].mxu1 }
 0x115   : > { %v1698_v20 = vadd.f32 %v579_v18, %v441_v12  ;;  %v1700_v21 = vadd.f32 %v622_v19, %v449_v13  ;;  %v581_v22 = vpop.f32.mrb[2].mxu0  ;;  %v624_v23 = vpop.f32.mrb[2].mxu1 }
 0x116   : > { %v629_v24 = vmul.f32 %v1694_v16, %v1694_v16  ;;  %v631_v25 = vmul.f32 %v1696_v17, %v1696_v17  ;;  %v1706_v26 = vadd.f32 %v581_v22, %v437_v10  ;;  %v1708_v27 = vadd.f32 %v624_v23, %v445_v11  ;;  %v583_v28 = vpop.f32.mrb[3].mxu0  ;;  %v626_v29 = vpop.f32.mrb[3].mxu1 }
 0x117   : > { %v630_v30 = vmul.f32 %v1698_v20, %v1698_v20  ;;  %v632_v31 = vmul.f32 %v1700_v21, %v1700_v21  ;;  %v1714_v32 = vadd.f32 %v583_v28, %v441_v12  ;;  %v1716_v33 = vadd.f32 %v626_v29, %v449_v13 }
 0x118   : > { %v637_v34 = vmul.f32 %v629_v24, %v1694_v16  ;;  %v639_v35 = vmul.f32 %v631_v25, %v1696_v17  ;;  %v633_v36 = vmul.f32 %v1706_v26, %v1706_v26  ;;  %v635_v37 = vmul.f32 %v1708_v27, %v1708_v27 }
 0x119   : > { %v638_v38 = vmul.f32 %v630_v30, %v1698_v20  ;;  %v640_v39 = vmul.f32 %v632_v31, %v1700_v21  ;;  %v634_v40 = vmul.f32 %v1714_v32, %v1714_v32  ;;  %v636_v41 = vmul.f32 %v1716_v33, %v1716_v33 }
 0x11a   : > { %v645_v42 = vmul.f32 0.044715, %v637_v34  ;;  %v647_v43 = vmul.f32 0.044715, %v639_v35  ;;  %v641_v44 = vmul.f32 %v633_v36, %v1706_v26  ;;  %v643_v45 = vmul.f32 %v635_v37, %v1708_v27 }
 0x11b   : > { %v646_v46 = vmul.f32 0.044715, %v638_v38  ;;  %v648_v47 = vmul.f32 0.044715, %v640_v39  ;;  %v642_v48 = vmul.f32 %v634_v40, %v1714_v32  ;;  %v644_v49 = vmul.f32 %v636_v41, %v1716_v33 }
 0x11c   : > { %v653_v50 = vadd.f32 %v645_v42, %v1694_v16  ;;  %v655_v51 = vadd.f32 %v647_v43, %v1696_v17  ;;  %v649_v52 = vmul.f32 0.044715, %v641_v44  ;;  %v651_v53 = vmul.f32 0.044715, %v643_v45 }
 0x11d   : > { %v654_v54 = vadd.f32 %v646_v46, %v1698_v20  ;;  %v656_v55 = vadd.f32 %v648_v47, %v1700_v21  ;;  %v650_v56 = vmul.f32 0.044715, %v642_v48  ;;  %v652_v57 = vmul.f32 0.044715, %v644_v49 }
 0x11e   : > { %v661_v58 = vmul.f32 0.7978846, %v653_v50  ;;  %v663_v59 = vmul.f32 0.7978846, %v655_v51  ;;  %v657_v60 = vadd.f32 %v649_v52, %v1706_v26  ;;  %v659_v61 = vadd.f32 %v651_v53, %v1708_v27  ;;  %v701_v53 = vld [vmem:[#allocation2] sm:$0xff] }
 0x11f   : > { %v662_v62 = vmul.f32 0.7978846, %v654_v54  ;;  %v664_v63 = vmul.f32 0.7978846, %v656_v55  ;;  %v658_v0 = vadd.f32 %v650_v56, %v1714_v32  ;;  %v660_v1 = vadd.f32 %v652_v57, %v1716_v33  ;;  %v702_v56 = vld [vmem:[#allocation2 + $0x8] sm:$0xff] }
 0x120   : > { %1454 = vtanh.f32 %v661_v58  ;;  %v665_v2 = vmul.f32 0.7978846, %v657_v60  ;;  %v667_v3 = vmul.f32 0.7978846, %v659_v61  ;;  %v1295_v61 = vld [vmem:[%s1794_s4] ss:$0 sm:$0xff] (!%p1294_p12) }
 0x121   : > { %1456 = vtanh.f32 %v663_v59  ;;  %v666_v4 = vmul.f32 0.7978846, %v658_v0  ;;  %v668_v5 = vmul.f32 0.7978846, %v660_v1 }
 0x122   : > { %1458 = vtanh.f32 %v662_v62  ;;  %v1308_v62 = vld [vmem:[%s1790_s0] sm:$0xff] (!%p1294_p12)  }
 0x123   : > { %1460 = vtanh.f32 %v664_v63  ;;  %v1309_v0 = vunpack.c.l.bf16 (!%p1294_p12), %v1308_v62 }
 0x124   : > { %1462 = vtanh.f32 %v665_v2  ;;  %v1310_v2 = vunpack.c.h.bf16 (!%p1294_p12), %v1308_v62 }
 0x125   : > { %1464 = vtanh.f32 %v667_v3 }
 0x126   : > { %1466 = vtanh.f32 %v666_v4 }
 0x127   : > { %1468 = vtanh.f32 %v668_v5 }
 0x12a   : > { %v1455_v6 = vpop.eup %1454 }
 0x12b   : > { %v1457_v7 = vpop.eup %1456  ;;  %v677_v8 = vadd.f32 1.0, %v1455_v6 }
 0x12c   : > { %v1459_v9 = vpop.eup %1458  ;;  %v679_v10 = vadd.f32 1.0, %v1457_v7 }
 0x12d   : > { %v1461_v11 = vpop.eup %1460  ;;  %v678_v12 = vadd.f32 1.0, %v1459_v9  ;;  %v685_v18 = vmul.f32 0.5, %v677_v8 }
 0x12e   : > { %v1463_v13 = vpop.eup %1462  ;;  %v680_v14 = vadd.f32 1.0, %v1461_v11  ;;  %v687_v23 = vmul.f32 0.5, %v679_v10 }
 0x12f   : > { %v1465_v15 = vpop.eup %1464  ;;  %v681_v19 = vadd.f32 1.0, %v1463_v13  ;;  %v686_v30 = vmul.f32 0.5, %v678_v12  ;;  %v693_v36 = vmul.f32 %v685_v18, %v1694_v16 }
 0x130   : > { %v1467_v22 = vpop.eup %1466  ;;  %v683_v24 = vadd.f32 1.0, %v1465_v15  ;;  %v688_v35 = vmul.f32 0.5, %v680_v14  ;;  %v695_v39 = vmul.f32 %v687_v23, %v1696_v17 }
 0x131   : > { %v1469_v25 = vpop.eup %1468  ;;  %v689_v28 = vmul.f32 0.5, %v681_v19  ;;  %v682_v29 = vadd.f32 1.0, %v1467_v22  ;;  %v694_v42 = vmul.f32 %v686_v30, %v1698_v20 }
 0x132   : > { %v691_v31 = vmul.f32 0.5, %v683_v24  ;;  %v684_v34 = vadd.f32 1.0, %v1469_v25  ;;  %v696_v45 = vmul.f32 %v688_v35, %v1700_v21  ;;  %v1297_v35 = vld [vmem:[%s1796_s6] ss:$0 sm:$0xff] (!%p1294_p12) }
 0x133   : > { %v697_v37 = vmul.f32 %v689_v28, %v1706_v26  ;;  %v690_v38 = vmul.f32 0.5, %v682_v29 }
 0x134   : > { %v699_v40 = vmul.f32 %v691_v31, %v1708_v27  ;;  %v692_v41 = vmul.f32 0.5, %v684_v34  ;;  %v1296_v31 = vld [vmem:[%s1795_s5] ss:$0 sm:$0xff] (!%p1294_p12) }
 0x135   : > { %v698_v43 = vmul.f32 %v690_v38, %v1714_v32  ;;  %v703_v44 = vpack.c.bf16 %v697_v37, %v693_v36 }
 0x136   : > { %v700_v46 = vmul.f32 %v692_v41, %v1716_v33  ;;  %v705_v47 = vpack.c.bf16 %v699_v40, %v695_v39 }
 0x137   : > { %v704_v48 = vpack.c.bf16 %v698_v43, %v694_v42 }
 0x138   : > { %v706_v16 = vpack.c.bf16 %v700_v46, %v696_v45 }
 0x139   : > { %995 = vmatprep.mubr.bf16.mxu0 %v704_v48 }
 0x13a   : > { %1036 = vmatprep.mubr.bf16.mxu1 %v706_v16  ;;  %996 = vmatmul.mubr.bf16.vlgmr.msra.gmra.mrb[4].mxu0 %v703_v44 }
 0x13b   : > { %1037 = vmatmul.mubr.bf16.vlgmr.msra.gmra.mrb[4].mxu1 %v705_v47 }
 0x20d   : > { %v1327_v17 = vpop.f32.mrb[4].mxu0 }
 0x20e   : > { %v1349_v26 = vpop.f32.mrb[4].mxu1  ;;  %v1328_v27 = vpop.f32.mrb[5].mxu0 }
 0x20f   : > { %v1329_v49 = vadd.f32 %v1328_v27, %v1327_v17  ;;  %v1350_v50 = vpop.f32.mrb[5].mxu1  ;;  %v1330_v20 = vpop.f32.mrb[6].mxu0 }
 0x210   : > { %v1351_v51 = vadd.f32 %v1350_v50, %v1349_v26  ;;  %v1352_v32 = vpop.f32.mrb[6].mxu1  ;;  %v1331_v52 = vpop.f32.mrb[7].mxu0 }
 0x211   : > { %v1332_v21 = vadd.f32 %v1331_v52, %v1330_v20  ;;  %v1353_v54 = vpop.f32.mrb[7].mxu1 }
 0x212   : > { %v1039_v33 = vadd.f32 %v1351_v51, %v1329_v49  ;;  %v1354_v55 = vadd.f32 %v1353_v54, %v1352_v32  ;;  %1052 = sbr.rel (%p1294_p12) target bundleno = 866 (0x362), region = 79 }
 0x214   : > { %v1045_v57 = vadd.f32 %v1039_v33, %v701_v53  ;;  %v1042_v58 = vadd.f32 %v1354_v55, %v1332_v21 }
 0x216   : > { %1047 = vst.msk [vmem:[#allocation2] sm:$0xff] %vm539_vm1, %v1045_v57  ;;  %v1046_v59 = vadd.f32 %v1042_v58, %v702_v56 }
 0x218   : > { %1048 = vst.msk [vmem:[#allocation2 + $0x8] sm:$0xff] %vm539_vm1, %v1046_v59 }
 0x21d   : > { %v1053_v60 = vld [vmem:[#allocation2] sm:$0xff] }
 0x21e   : > { %v1062_v63 = vadd.f32 %v1295_v61, %v1053_v60 }
 0x21f   : > { %v1054_v1 = vld [vmem:[#allocation2 + $0x8] sm:$0xff] }
 0x220   : > { %v1063_v3 = vadd.f32 %v1295_v61, %v1054_v1  ;;  %v1068_v4 = vadd.f32 %v1309_v0, %v1062_v63 }
 0x222   : > { %v1069_v5 = vadd.f32 %v1310_v2, %v1063_v3  ;;  %v1070_v6 = vsel %vm539_vm1, %v1068_v4, 0.0 }
 0x223   : > { %1071 = vadd.xlane.f32.xlu0 %v1070_v6 }
 0x224   : > { %v1073_v7 = vsel %vm539_vm1, %v1069_v5, 0.0 }
 0x227   : > { %1074 = vadd.xlane.f32.xlu0 %v1073_v7 }
 0x2b0   : > { %v1072_v8 = vpop.xlane.xlu0 %1071 }
 0x2b1   : > { %v1077_v9 = vmul.f32 0.015625, %v1072_v8 }
 0x2b3   : > { %v1079_v10 = vsub.f32 %v1068_v4, %v1077_v9 }
 0x2b4   : > { %v1075_v11 = vpop.xlane.xlu0 %1074 }
 0x2b5   : > { %v1078_v12 = vmul.f32 0.015625, %v1075_v11  ;;  %v1081_v13 = vmul.f32 %v1079_v10, %v1079_v10 }
 0x2b7   : > { %v1080_v14 = vsub.f32 %v1069_v5, %v1078_v12  ;;  %v1083_v15 = vsel %vm539_vm1, %v1081_v13, 0.0 }
 0x2b8   : > { %1084 = vadd.xlane.f32.xlu1 %v1083_v15 }
 0x2b9   : > { %v1082_v18 = vmul.f32 %v1080_v14, %v1080_v14 }
 0x2bb   : > { %v1086_v19 = vsel %vm539_vm1, %v1082_v18, 0.0 }
 0x2bc   : > { %1087 = vadd.xlane.f32.xlu1 %v1086_v19 }
 0x345   : > { %v1085_v22 = vpop.xlane.xlu1 %1084 }
 0x346   : > { %v1089_v23 = vmul.f32 0.015625, %v1085_v22 }
 0x348   : > { %v1091_v24 = vadd.f32 1e-12, %v1089_v23 }
 0x349   : > { %v1088_v25 = vpop.xlane.xlu1 %1087 }
 0x34a   : > { %1470 = vrsqrt.f32 %v1091_v24  ;;  %v1090_v28 = vmul.f32 0.015625, %v1088_v25 }
 0x34c   : > { %v1092_v29 = vadd.f32 1e-12, %v1090_v28 }
 0x34e   : > { %1472 = vrsqrt.f32 %v1092_v29 }
 0x354   : > { %v1471_v30 = vpop.eup %1470 }
 0x355   : > { %v1095_v34 = vmul.f32 %v1471_v30, %v1079_v10 }
 0x357   : > { %v1104_v36 = vmul.f32 %v1296_v31, %v1095_v34 }
 0x358   : > { %v1473_v37 = vpop.eup %1472 }
 0x359   : > { %v1113_v38 = vadd.f32 %v1297_v35, %v1104_v36  ;;  %v1096_v39 = vmul.f32 %v1473_v37, %v1080_v14 }
 0x35b   : > { %v1305_v40 = vpack.c.bf16 %v1113_v38, %v1113_v38  ;;  %v1105_v41 = vmul.f32 %v1296_v31, %v1096_v39 }
 0x35d   : > { %1124 = vst.msk [vmem:[%s1797_s7] sm:$0xf] %vm1123_vm2, %v1305_v40  ;;  %v1114_v42 = vadd.f32 %v1297_v35, %v1105_v41 }
 0x35f   : > { %v1306_v43 = vpack.c.bf16 %v1114_v42, %v1114_v42 }
 0x361   : > { %1125 = vst.msk [vmem:[%s1797_s7 + $0x4] sm:$0xf] %vm1123_vm2, %v1306_v43 }
 0x362 PF: > { %s17_s28 = sadd.s32 1, %s1512_s28   ;;  %s1798_s24 = smov %s1500_s25 }
 0x363   : > { %p14_p13 = scmp.ge.s32.totalorder %s17_s28, 4   ;;  %s1799_s25 = smov %s1591_s9 }
 0x364   : > { %s1800_s26 = smov %s1508_s27  ;;  %s1801_s27 = smov %s1803_s29 }
 0x365   :  { %16 = sbr.rel (!%p14_p13) target bundleno = 3 (0x3), region = 123 }

</bundles_post_ra>
